<compile_context>
chip_gen: v7x
topology: tpu7x:2x2x1
jax: 0.10.0
libtpu: 0.0.40
codegen_flags: <defaults>
</compile_context>

<pallas_src>
import jax
import jax.numpy as jnp
from jax import lax
from jax.experimental import pallas as pl
from jax.experimental.pallas import tpu as pltpu


def _bottleneck_kernel(x_ref, xt_ref, xb_ref, w1_ref, w2_ref, w3_ref,
                       s1_ref, b1_ref, s2_ref, b2_ref, s3_ref, b3_ref,
                       o_ref):
    # x_ref : (1, TH, W, Cp)  current row strip (f32)
    # xt_ref: (1, 1,  W, Cp)  row just above the strip (clamped at image top)
    # xb_ref: (1, 1,  W, Cp)  row just below the strip (clamped at image bottom)
    # w1_ref: (Cp, Pp) bf16 ; w2_ref: (3, 3*Pp, Pp) bf16 [dy, dx*ci, co]
    # w3_ref: (Pp, Cp) bf16 ; s*/b*: (1, Pp) or (1, Cp) f32
    _, TH, W, Cp = x_ref.shape
    Pp = w1_ref.shape[1]
    R = (TH + 2) * W

    strip = pl.program_id(1)
    last = pl.num_programs(1) - 1

    # Strip plus 1-row halos -> (TH+2, W, Cp); kept in f32 for the residual add.
    x_full = jnp.concatenate([xt_ref[0], x_ref[0], xb_ref[0]], axis=0)

    # ---- conv1 (1x1) + bn1 + relu (bf16 MXU operands, f32 accumulation) -----
    x2d = x_full.reshape(R, Cp)
    t = jnp.dot(x2d.astype(jnp.bfloat16), w1_ref[...],
                preferred_element_type=jnp.float32)
    t = jnp.maximum(t * s1_ref[...] + b1_ref[...], 0.0)          # (R, Pp)
    t3 = t.reshape(TH + 2, W, Pp)

    # conv2 zero-padding in H: zero the halo rows when they lie outside the
    # image (they then act as the padding=1 zeros of the 3x3 conv).
    top_keep = (strip > 0).astype(jnp.float32)
    bot_keep = (strip < last).astype(jnp.float32)
    t3 = jnp.concatenate(
        [t3[0:1] * top_keep, t3[1:TH + 1], t3[TH + 1:TH + 2] * bot_keep],
        axis=0)
    t3 = t3.astype(jnp.bfloat16)

    # ---- conv2 (3x3, pad 1): shift-and-stack along W -> 3 matmuls, K = 3*Pp --
    zcol = jnp.zeros((TH + 2, 1, Pp), jnp.bfloat16)
    wm1 = jnp.concatenate([zcol, t3[:, :W - 1, :]], axis=1)   # value at w-1
    wp1 = jnp.concatenate([t3[:, 1:, :], zcol], axis=1)       # value at w+1
    big = jnp.concatenate([wm1, t3, wp1], axis=-1)            # (TH+2, W, 3*Pp)

    acc = jnp.dot(big[0:TH].reshape(TH * W, 3 * Pp), w2_ref[0],
                  preferred_element_type=jnp.float32)
    acc += jnp.dot(big[1:TH + 1].reshape(TH * W, 3 * Pp), w2_ref[1],
                   preferred_element_type=jnp.float32)
    acc += jnp.dot(big[2:TH + 2].reshape(TH * W, 3 * Pp), w2_ref[2],
                   preferred_element_type=jnp.float32)
    acc = jnp.maximum(acc * s2_ref[...] + b2_ref[...], 0.0)       # (TH*W, Pp)

    # ---- conv3 (1x1) + bn3 + residual add + relu ----------------------------
    out = jnp.dot(acc.astype(jnp.bfloat16), w3_ref[...],
                  preferred_element_type=jnp.float32)
    out = out * s3_ref[...] + b3_ref[...]
    out = jnp.maximum(out + x_ref[0].reshape(TH * W, Cp), 0.0)
    o_ref[...] = out.reshape(1, TH, W, Cp)


def _round_up(n, m):
    return (n + m - 1) // m * m


def _pad_axis(a, axis, size):
    pad = size - a.shape[axis]
    if pad == 0:
        return a
    widths = [(0, 0)] * a.ndim
    widths[axis] = (0, pad)
    return jnp.pad(a, widths)


def bottleneck_forward(x, w1, w2, w3, s1, b1, s2, b2, s3, b3, *, tile_h=8):
    """x: (N, H, W, Cin) f32; w1: (Cin, P); w2: (3,3,P,P) HWIO; w3: (P, Cin)."""
    N, H, W, Cin = x.shape
    P = w1.shape[1]
    Cp = _round_up(Cin, 128)                     # lane-dense channel dims
    Pp = _round_up(P, 128)
    TH = tile_h if (H % tile_h == 0) else H      # row-strip height
    n_strips = H // TH

    # Caller-side zero padding of channel dims; BN scale/shift are padded with
    # zeros so padded channels stay exactly zero through the whole block.
    xp = _pad_axis(x, 3, Cp).astype(jnp.float32)
    w1p = _pad_axis(_pad_axis(w1, 0, Cp), 1, Pp).astype(jnp.bfloat16)
    w2p = _pad_axis(_pad_axis(w2, 2, Pp), 3, Pp)
    w2p = w2p.reshape(3, 3 * Pp, Pp).astype(jnp.bfloat16)     # [dy, dx*ci, co]
    w3p = _pad_axis(_pad_axis(w3, 0, Pp), 1, Cp).astype(jnp.bfloat16)
    s1p, b1p = _pad_axis(s1, 1, Pp), _pad_axis(b1, 1, Pp)
    s2p, b2p = _pad_axis(s2, 1, Pp), _pad_axis(b2, 1, Pp)
    s3p, b3p = _pad_axis(s3, 1, Cp), _pad_axis(b3, 1, Cp)

    def full_spec(a):
        nd = a.ndim
        return pl.BlockSpec(a.shape, lambda n, i: (0,) * nd)

    out_p = pl.pallas_call(
        _bottleneck_kernel,
        out_shape=jax.ShapeDtypeStruct((N, H, W, Cp), jnp.float32),
        grid_spec=pltpu.PrefetchScalarGridSpec(
            num_scalar_prefetch=0,
            grid=(N, n_strips),
            in_specs=[
                # current row strip
                pl.BlockSpec((1, TH, W, Cp), lambda n, i: (n, i, 0, 0)),
                # 1-row halos (size-1 block along H => block index == row index)
                pl.BlockSpec((1, 1, W, Cp),
                             lambda n, i: (n, jnp.maximum(i * TH - 1, 0), 0, 0)),
                pl.BlockSpec((1, 1, W, Cp),
                             lambda n, i: (n, jnp.minimum(i * TH + TH, H - 1), 0, 0)),
                full_spec(w1p), full_spec(w2p), full_spec(w3p),
                full_spec(s1p), full_spec(b1p),
                full_spec(s2p), full_spec(b2p),
                full_spec(s3p), full_spec(b3p),
            ],
            out_specs=pl.BlockSpec((1, TH, W, Cp), lambda n, i: (n, i, 0, 0)),
        ),
        compiler_params=pltpu.CompilerParams(
            dimension_semantics=("parallel", "parallel"),
            vmem_limit_bytes=48 * 1024 * 1024),
    )(xp, xp, xp, w1p, w2p, w3p, s1p, b1p, s2p, b2p, s3p, b3p)
    return out_p[..., :Cin]


def fold_bn(gamma, beta, mean, var, eps=1e-5):
    scale = gamma / jnp.sqrt(var + eps)
    shift = beta - mean * scale
    return (scale.reshape(1, -1).astype(jnp.float32),
            shift.reshape(1, -1).astype(jnp.float32))


def reference_forward(x, w1, w2, w3, s1, b1, s2, b2, s3, b3):
    """Pure-JAX reference (NHWC / HWIO), f32."""
    dn = ('NHWC', 'HWIO', 'NHWC')
    Cin = x.shape[-1]
    P = w1.shape[1]
    t = lax.conv_general_dilated(x, w1.reshape(1, 1, Cin, P), (1, 1), 'VALID',
                                 dimension_numbers=dn)
    t = jnp.maximum(t * s1 + b1, 0.0)
    t = lax.conv_general_dilated(t, w2, (1, 1), ((1, 1), (1, 1)),
                                 dimension_numbers=dn)
    t = jnp.maximum(t * s2 + b2, 0.0)
    t = lax.conv_general_dilated(t, w3.reshape(1, 1, P, Cin), (1, 1), 'VALID',
                                 dimension_numbers=dn)
    t = t * s3 + b3
    return jnp.maximum(t + x, 0.0)


if __name__ == "__main__":
    key = jax.random.PRNGKey(0)
    planes = 8
    inplanes = planes * 4          # expansion = 4, downsample=None requires this
    N, H, W = 2, 16, 16

    ks = jax.random.split(key, 8)
    x = jax.random.normal(ks[0], (N, H, W, inplanes), jnp.float32)

    # conv weights (HWIO-style; 1x1 convs stored as plain matrices)
    w1 = jax.random.normal(ks[1], (inplanes, planes), jnp.float32) * 0.1
    w2 = jax.random.normal(ks[2], (3, 3, planes, planes), jnp.float32) * 0.1
    w3 = jax.random.normal(ks[3], (planes, inplanes), jnp.float32) * 0.1

    # BatchNorm (eval mode) parameters, folded to scale/shift
    def bn_params(k, c):
        k1, k2, k3, k4 = jax.random.split(k, 4)
        gamma = jax.random.uniform(k1, (c,), jnp.float32, 0.5, 1.5)
        beta = jax.random.normal(k2, (c,), jnp.float32) * 0.1
        mean = jax.random.normal(k3, (c,), jnp.float32) * 0.1
        var = jax.random.uniform(k4, (c,), jnp.float32, 0.5, 1.5)
        return fold_bn(gamma, beta, mean, var)

    s1, b1 = bn_params(ks[4], planes)
    s2, b2 = bn_params(ks[5], planes)
    s3, b3 = bn_params(ks[6], inplanes)

    out = bottleneck_forward(x, w1, w2, w3, s1, b1, s2, b2, s3, b3)
    out = jax.block_until_ready(out)

    ref = reference_forward(x, w1, w2, w3, s1, b1, s2, b2, s3, b3)
    assert out.shape == (N, H, W, inplanes)
    max_err = jnp.max(jnp.abs(out - ref))
    # bf16 MXU operands (f32 accumulation) => loosened tolerance vs pure-f32 ref.
    assert jnp.allclose(out, ref, atol=3e-2, rtol=3e-2), (
        f"mismatch vs reference, max abs err {max_err}")

    print("KERNEL_OK")
</pallas_src>

<mosaic_0001>
module attributes {stable_mosaic.version = 11 : i64} {
  func.func @_bottleneck_kernel(%arg0: i32, %arg1: i32, %arg2: memref<1x8x16x128xf32, #tpu.memory_space<vmem>>, %arg3: memref<1x1x16x128xf32, #tpu.memory_space<vmem>>, %arg4: memref<1x1x16x128xf32, #tpu.memory_space<vmem>>, %arg5: memref<128x128xbf16, #tpu.memory_space<vmem>>, %arg6: memref<3x384x128xbf16, #tpu.memory_space<vmem>>, %arg7: memref<128x128xbf16, #tpu.memory_space<vmem>>, %arg8: memref<1x128xf32, #tpu.memory_space<vmem>>, %arg9: memref<1x128xf32, #tpu.memory_space<vmem>>, %arg10: memref<1x128xf32, #tpu.memory_space<vmem>>, %arg11: memref<1x128xf32, #tpu.memory_space<vmem>>, %arg12: memref<1x128xf32, #tpu.memory_space<vmem>>, %arg13: memref<1x128xf32, #tpu.memory_space<vmem>>, %arg14: memref<1x8x16x128xf32, #tpu.memory_space<vmem>>) attributes {dimension_semantics = [#tpu.dimension_semantics<parallel>, #tpu.dimension_semantics<parallel>], iteration_bounds = array<i64: 2, 2>, scalar_prefetch = 0 : i64, scratch_operands = 0 : i64, tpu.core_type = #tpu.core_type<tc>, window_params = [{transform_indices = @transform_0, window_bounds = array<i64: 1, 8, 16, 128>}, {transform_indices = @transform_1, window_bounds = array<i64: 1, 1, 16, 128>}, {transform_indices = @transform_2, window_bounds = array<i64: 1, 1, 16, 128>}, {pipeline_mode = #tpu.pipeline_mode<synchronous>, transform_indices = @transform_3, window_bounds = array<i64: 128, 128>}, {pipeline_mode = #tpu.pipeline_mode<synchronous>, transform_indices = @transform_4, window_bounds = array<i64: 3, 384, 128>}, {pipeline_mode = #tpu.pipeline_mode<synchronous>, transform_indices = @transform_5, window_bounds = array<i64: 128, 128>}, {pipeline_mode = #tpu.pipeline_mode<synchronous>, transform_indices = @transform_6, window_bounds = array<i64: 1, 128>}, {pipeline_mode = #tpu.pipeline_mode<synchronous>, transform_indices = @transform_7, window_bounds = array<i64: 1, 128>}, {pipeline_mode = #tpu.pipeline_mode<synchronous>, transform_indices = @transform_8, window_bounds = array<i64: 1, 128>}, {pipeline_mode = #tpu.pipeline_mode<synchronous>, transform_indices = @transform_9, window_bounds = array<i64: 1, 128>}, {pipeline_mode = #tpu.pipeline_mode<synchronous>, transform_indices = @transform_10, window_bounds = array<i64: 1, 128>}, {pipeline_mode = #tpu.pipeline_mode<synchronous>, transform_indices = @transform_11, window_bounds = array<i64: 1, 128>}, {transform_indices = @transform_12, window_bounds = array<i64: 1, 8, 16, 128>}]} {
    %c0 = arith.constant 0 : index
    %c0_0 = arith.constant 0 : index
    %c0_1 = arith.constant 0 : index
    %c0_2 = arith.constant 0 : index
    %0 = vector.load %arg3[%c0, %c0_0, %c0_1, %c0_2] : memref<1x1x16x128xf32, #tpu.memory_space<vmem>>, vector<1x1x16x128xf32>
    %1 = vector.shape_cast %0 : vector<1x1x16x128xf32> to vector<1x16x128xf32>
    %c0_3 = arith.constant 0 : index
    %c0_4 = arith.constant 0 : index
    %c0_5 = arith.constant 0 : index
    %c0_6 = arith.constant 0 : index
    %2 = vector.load %arg2[%c0_3, %c0_4, %c0_5, %c0_6] : memref<1x8x16x128xf32, #tpu.memory_space<vmem>>, vector<1x8x16x128xf32>
    %3 = vector.shape_cast %2 : vector<1x8x16x128xf32> to vector<8x16x128xf32>
    %c0_7 = arith.constant 0 : index
    %c0_8 = arith.constant 0 : index
    %c0_9 = arith.constant 0 : index
    %c0_10 = arith.constant 0 : index
    %4 = vector.load %arg4[%c0_7, %c0_8, %c0_9, %c0_10] : memref<1x1x16x128xf32, #tpu.memory_space<vmem>>, vector<1x1x16x128xf32>
    %5 = vector.shape_cast %4 : vector<1x1x16x128xf32> to vector<1x16x128xf32>
    %6 = tpu.concatenate %1, %3, %5 in 0 : vector<1x16x128xf32>, vector<8x16x128xf32>, vector<1x16x128xf32> -> vector<10x16x128xf32>
    %7 = vector.shape_cast %6 : vector<10x16x128xf32> to vector<160x128xf32>
    %8 = arith.truncf %7 : vector<160x128xf32> to vector<160x128xbf16>
    %c0_11 = arith.constant 0 : index
    %c0_12 = arith.constant 0 : index
    %9 = vector.load %arg5[%c0_11, %c0_12] : memref<128x128xbf16, #tpu.memory_space<vmem>>, vector<128x128xbf16>
    %cst = arith.constant dense<0.000000e+00> : vector<160x128xf32>
    %10 = tpu.matmul %8, %9, %cst {dimension_numbers = #tpu.dot_dimension_numbers<[1], [0], [0], [1], [0, 0, 1, 1], [], []>} : vector<160x128xbf16>, vector<128x128xbf16>, vector<160x128xf32> -> vector<160x128xf32>
    %c0_13 = arith.constant 0 : index
    %c0_14 = arith.constant 0 : index
    %11 = vector.load %arg8[%c0_13, %c0_14] : memref<1x128xf32, #tpu.memory_space<vmem>>, vector<1x128xf32>
    %12 = vector.broadcast %11 : vector<1x128xf32> to vector<160x128xf32>
    %13 = arith.mulf %10, %12 : vector<160x128xf32>
    %c0_15 = arith.constant 0 : index
    %c0_16 = arith.constant 0 : index
    %14 = vector.load %arg9[%c0_15, %c0_16] : memref<1x128xf32, #tpu.memory_space<vmem>>, vector<1x128xf32>
    %15 = vector.broadcast %14 : vector<1x128xf32> to vector<160x128xf32>
    %16 = arith.addf %13, %15 : vector<160x128xf32>
    %cst_17 = arith.constant 0.000000e+00 : f32
    %17 = vector.broadcast %cst_17 : f32 to vector<160x128xf32>
    %18 = arith.maximumf %16, %17 : vector<160x128xf32>
    %19 = vector.shape_cast %18 : vector<160x128xf32> to vector<10x16x128xf32>
    %c0_i32 = arith.constant 0 : i32
    %20 = arith.cmpi sgt, %arg1, %c0_i32 : i32
    %21 = arith.extui %20 : i1 to i32
    %22 = arith.sitofp %21 : i32 to f32
    %c1_i32 = arith.constant 1 : i32
    %23 = arith.cmpi slt, %arg1, %c1_i32 : i32
    %24 = arith.extui %23 : i1 to i32
    %25 = arith.sitofp %24 : i32 to f32
    %26 = vector.extract_strided_slice %19 {offsets = [0, 0, 0], sizes = [1, 16, 128], strides = [1, 1, 1]} : vector<10x16x128xf32> to vector<1x16x128xf32>
    %27 = vector.broadcast %22 : f32 to vector<1x16x128xf32>
    %28 = arith.mulf %26, %27 : vector<1x16x128xf32>
    %29 = vector.extract_strided_slice %19 {offsets = [1, 0, 0], sizes = [8, 16, 128], strides = [1, 1, 1]} : vector<10x16x128xf32> to vector<8x16x128xf32>
    %30 = vector.extract_strided_slice %19 {offsets = [9, 0, 0], sizes = [1, 16, 128], strides = [1, 1, 1]} : vector<10x16x128xf32> to vector<1x16x128xf32>
    %31 = vector.broadcast %25 : f32 to vector<1x16x128xf32>
    %32 = arith.mulf %30, %31 : vector<1x16x128xf32>
    %33 = tpu.concatenate %28, %29, %32 in 0 : vector<1x16x128xf32>, vector<8x16x128xf32>, vector<1x16x128xf32> -> vector<10x16x128xf32>
    %34 = arith.truncf %33 : vector<10x16x128xf32> to vector<10x16x128xbf16>
    %cst_18 = arith.constant 0.000000e+00 : bf16
    %35 = vector.broadcast %cst_18 : bf16 to vector<10x1x128xbf16>
    %36 = vector.extract_strided_slice %34 {offsets = [0, 0, 0], sizes = [10, 15, 128], strides = [1, 1, 1]} : vector<10x16x128xbf16> to vector<10x15x128xbf16>
    %37 = tpu.concatenate %35, %36 in 1 : vector<10x1x128xbf16>, vector<10x15x128xbf16> -> vector<10x16x128xbf16>
    %38 = vector.extract_strided_slice %34 {offsets = [0, 1, 0], sizes = [10, 15, 128], strides = [1, 1, 1]} : vector<10x16x128xbf16> to vector<10x15x128xbf16>
    %39 = tpu.concatenate %38, %35 in 1 : vector<10x15x128xbf16>, vector<10x1x128xbf16> -> vector<10x16x128xbf16>
    %40 = tpu.concatenate %37, %34, %39 in 2 : vector<10x16x128xbf16>, vector<10x16x128xbf16>, vector<10x16x128xbf16> -> vector<10x16x384xbf16>
    %41 = vector.extract_strided_slice %40 {offsets = [0, 0, 0], sizes = [8, 16, 384], strides = [1, 1, 1]} : vector<10x16x384xbf16> to vector<8x16x384xbf16>
    %42 = vector.shape_cast %41 : vector<8x16x384xbf16> to vector<128x384xbf16>
    %c0_19 = arith.constant 0 : index
    %c0_20 = arith.constant 0 : index
    %c0_21 = arith.constant 0 : index
    %43 = vector.load %arg6[%c0_19, %c0_20, %c0_21] : memref<3x384x128xbf16, #tpu.memory_space<vmem>>, vector<1x384x128xbf16>
    %44 = vector.shape_cast %43 : vector<1x384x128xbf16> to vector<384x128xbf16>
    %cst_22 = arith.constant dense<0.000000e+00> : vector<128x128xf32>
    %45 = tpu.matmul %42, %44, %cst_22 {dimension_numbers = #tpu.dot_dimension_numbers<[1], [0], [0], [1], [0, 0, 1, 1], [], []>} : vector<128x384xbf16>, vector<384x128xbf16>, vector<128x128xf32> -> vector<128x128xf32>
    %46 = vector.extract_strided_slice %40 {offsets = [1, 0, 0], sizes = [8, 16, 384], strides = [1, 1, 1]} : vector<10x16x384xbf16> to vector<8x16x384xbf16>
    %47 = vector.shape_cast %46 : vector<8x16x384xbf16> to vector<128x384xbf16>
    %c1 = arith.constant 1 : index
    %c0_23 = arith.constant 0 : index
    %c0_24 = arith.constant 0 : index
    %48 = vector.load %arg6[%c1, %c0_23, %c0_24] : memref<3x384x128xbf16, #tpu.memory_space<vmem>>, vector<1x384x128xbf16>
    %49 = vector.shape_cast %48 : vector<1x384x128xbf16> to vector<384x128xbf16>
    %cst_25 = arith.constant dense<0.000000e+00> : vector<128x128xf32>
    %50 = tpu.matmul %47, %49, %cst_25 {dimension_numbers = #tpu.dot_dimension_numbers<[1], [0], [0], [1], [0, 0, 1, 1], [], []>} : vector<128x384xbf16>, vector<384x128xbf16>, vector<128x128xf32> -> vector<128x128xf32>
    %51 = arith.addf %45, %50 : vector<128x128xf32>
    %52 = vector.extract_strided_slice %40 {offsets = [2, 0, 0], sizes = [8, 16, 384], strides = [1, 1, 1]} : vector<10x16x384xbf16> to vector<8x16x384xbf16>
    %53 = vector.shape_cast %52 : vector<8x16x384xbf16> to vector<128x384xbf16>
    %c2 = arith.constant 2 : index
    %c0_26 = arith.constant 0 : index
    %c0_27 = arith.constant 0 : index
    %54 = vector.load %arg6[%c2, %c0_26, %c0_27] : memref<3x384x128xbf16, #tpu.memory_space<vmem>>, vector<1x384x128xbf16>
    %55 = vector.shape_cast %54 : vector<1x384x128xbf16> to vector<384x128xbf16>
    %cst_28 = arith.constant dense<0.000000e+00> : vector<128x128xf32>
    %56 = tpu.matmul %53, %55, %cst_28 {dimension_numbers = #tpu.dot_dimension_numbers<[1], [0], [0], [1], [0, 0, 1, 1], [], []>} : vector<128x384xbf16>, vector<384x128xbf16>, vector<128x128xf32> -> vector<128x128xf32>
    %57 = arith.addf %51, %56 : vector<128x128xf32>
    %c0_29 = arith.constant 0 : index
    %c0_30 = arith.constant 0 : index
    %58 = vector.load %arg10[%c0_29, %c0_30] : memref<1x128xf32, #tpu.memory_space<vmem>>, vector<1x128xf32>
    %59 = vector.broadcast %58 : vector<1x128xf32> to vector<128x128xf32>
    %60 = arith.mulf %57, %59 : vector<128x128xf32>
    %c0_31 = arith.constant 0 : index
    %c0_32 = arith.constant 0 : index
    %61 = vector.load %arg11[%c0_31, %c0_32] : memref<1x128xf32, #tpu.memory_space<vmem>>, vector<1x128xf32>
    %62 = vector.broadcast %61 : vector<1x128xf32> to vector<128x128xf32>
    %63 = arith.addf %60, %62 : vector<128x128xf32>
    %cst_33 = arith.constant 0.000000e+00 : f32
    %64 = vector.broadcast %cst_33 : f32 to vector<128x128xf32>
    %65 = arith.maximumf %63, %64 : vector<128x128xf32>
    %66 = arith.truncf %65 : vector<128x128xf32> to vector<128x128xbf16>
    %c0_34 = arith.constant 0 : index
    %c0_35 = arith.constant 0 : index
    %67 = vector.load %arg7[%c0_34, %c0_35] : memref<128x128xbf16, #tpu.memory_space<vmem>>, vector<128x128xbf16>
    %cst_36 = arith.constant dense<0.000000e+00> : vector<128x128xf32>
    %68 = tpu.matmul %66, %67, %cst_36 {dimension_numbers = #tpu.dot_dimension_numbers<[1], [0], [0], [1], [0, 0, 1, 1], [], []>} : vector<128x128xbf16>, vector<128x128xbf16>, vector<128x128xf32> -> vector<128x128xf32>
    %c0_37 = arith.constant 0 : index
    %c0_38 = arith.constant 0 : index
    %69 = vector.load %arg12[%c0_37, %c0_38] : memref<1x128xf32, #tpu.memory_space<vmem>>, vector<1x128xf32>
    %70 = vector.broadcast %69 : vector<1x128xf32> to vector<128x128xf32>
    %71 = arith.mulf %68, %70 : vector<128x128xf32>
    %c0_39 = arith.constant 0 : index
    %c0_40 = arith.constant 0 : index
    %72 = vector.load %arg13[%c0_39, %c0_40] : memref<1x128xf32, #tpu.memory_space<vmem>>, vector<1x128xf32>
    %73 = vector.broadcast %72 : vector<1x128xf32> to vector<128x128xf32>
    %74 = arith.addf %71, %73 : vector<128x128xf32>
    %c0_41 = arith.constant 0 : index
    %c0_42 = arith.constant 0 : index
    %c0_43 = arith.constant 0 : index
    %c0_44 = arith.constant 0 : index
    %75 = vector.load %arg2[%c0_41, %c0_42, %c0_43, %c0_44] : memref<1x8x16x128xf32, #tpu.memory_space<vmem>>, vector<1x8x16x128xf32>
    %76 = vector.shape_cast %75 : vector<1x8x16x128xf32> to vector<8x16x128xf32>
    %77 = vector.shape_cast %76 : vector<8x16x128xf32> to vector<128x128xf32>
    %78 = arith.addf %74, %77 : vector<128x128xf32>
    %cst_45 = arith.constant 0.000000e+00 : f32
    %79 = vector.broadcast %cst_45 : f32 to vector<128x128xf32>
    %80 = arith.maximumf %78, %79 : vector<128x128xf32>
    %81 = vector.shape_cast %80 : vector<128x128xf32> to vector<1x8x16x128xf32>
    %c0_46 = arith.constant 0 : index
    %c0_47 = arith.constant 0 : index
    %c0_48 = arith.constant 0 : index
    %c0_49 = arith.constant 0 : index
    %82 = vector.load %arg14[%c0_46, %c0_47, %c0_48, %c0_49] : memref<1x8x16x128xf32, #tpu.memory_space<vmem>>, vector<1x8x16x128xf32>
    tpu.vector_store %arg14[%c0_46, %c0_47, %c0_48, %c0_49], %81 {strides = array<i32>} : memref<1x8x16x128xf32, #tpu.memory_space<vmem>>, vector<1x8x16x128xf32>,
    return
  }
  func.func @transform_0(%arg0: i32, %arg1: i32) -> (i32, i32, i32, i32) {
    %c0_i32 = arith.constant 0 : i32
    %c0_i32_0 = arith.constant 0 : i32
    %c0_i32_1 = arith.constant 0 : i32
    return %arg0, %arg1, %c0_i32, %c0_i32_0 : i32, i32, i32, i32
  }
  func.func @transform_1(%arg0: i32, %arg1: i32) -> (i32, i32, i32, i32) {
    %c8_i32 = arith.constant 8 : i32
    %0 = arith.muli %arg1, %c8_i32 : i32
    %c1_i32 = arith.constant 1 : i32
    %1 = arith.subi %0, %c1_i32 : i32
    %c0_i32 = arith.constant 0 : i32
    %2 = arith.maxsi %1, %c0_i32 : i32
    %c0_i32_0 = arith.constant 0 : i32
    %c0_i32_1 = arith.constant 0 : i32
    %c0_i32_2 = arith.constant 0 : i32
    return %arg0, %2, %c0_i32_0, %c0_i32_1 : i32, i32, i32, i32
  }
  func.func @transform_2(%arg0: i32, %arg1: i32) -> (i32, i32, i32, i32) {
    %c8_i32 = arith.constant 8 : i32
    %0 = arith.muli %arg1, %c8_i32 : i32
    %c8_i32_0 = arith.constant 8 : i32
    %1 = arith.addi %0, %c8_i32_0 : i32
    %c15_i32 = arith.constant 15 : i32
    %2 = arith.minsi %1, %c15_i32 : i32
    %c0_i32 = arith.constant 0 : i32
    %c0_i32_1 = arith.constant 0 : i32
    %c0_i32_2 = arith.constant 0 : i32
    return %arg0, %2, %c0_i32, %c0_i32_1 : i32, i32, i32, i32
  }
  func.func @transform_3(%arg0: i32, %arg1: i32) -> (i32, i32) {
    %c0_i32 = arith.constant 0 : i32
    %c0_i32_0 = arith.constant 0 : i32
    %c0_i32_1 = arith.constant 0 : i32
    return %c0_i32, %c0_i32_0 : i32, i32
  }
  func.func @transform_4(%arg0: i32, %arg1: i32) -> (i32, i32, i32) {
    %c0_i32 = arith.constant 0 : i32
    %c0_i32_0 = arith.constant 0 : i32
    %c0_i32_1 = arith.constant 0 : i32
    %c0_i32_2 = arith.constant 0 : i32
    return %c0_i32, %c0_i32_0, %c0_i32_1 : i32, i32, i32
  }
  func.func @transform_5(%arg0: i32, %arg1: i32) -> (i32, i32) {
    %c0_i32 = arith.constant 0 : i32
    %c0_i32_0 = arith.constant 0 : i32
    %c0_i32_1 = arith.constant 0 : i32
    return %c0_i32, %c0_i32_0 : i32, i32
  }
  func.func @transform_6(%arg0: i32, %arg1: i32) -> (i32, i32) {
    %c0_i32 = arith.constant 0 : i32
    %c0_i32_0 = arith.constant 0 : i32
    %c0_i32_1 = arith.constant 0 : i32
    return %c0_i32, %c0_i32_0 : i32, i32
  }
  func.func @transform_7(%arg0: i32, %arg1: i32) -> (i32, i32) {
    %c0_i32 = arith.constant 0 : i32
    %c0_i32_0 = arith.constant 0 : i32
    %c0_i32_1 = arith.constant 0 : i32
    return %c0_i32, %c0_i32_0 : i32, i32
  }
  func.func @transform_8(%arg0: i32, %arg1: i32) -> (i32, i32) {
    %c0_i32 = arith.constant 0 : i32
    %c0_i32_0 = arith.constant 0 : i32
    %c0_i32_1 = arith.constant 0 : i32
    return %c0_i32, %c0_i32_0 : i32, i32
  }
  func.func @transform_9(%arg0: i32, %arg1: i32) -> (i32, i32) {
    %c0_i32 = arith.constant 0 : i32
    %c0_i32_0 = arith.constant 0 : i32
    %c0_i32_1 = arith.constant 0 : i32
    return %c0_i32, %c0_i32_0 : i32, i32
  }
  func.func @transform_10(%arg0: i32, %arg1: i32) -> (i32, i32) {
    %c0_i32 = arith.constant 0 : i32
    %c0_i32_0 = arith.constant 0 : i32
    %c0_i32_1 = arith.constant 0 : i32
    return %c0_i32, %c0_i32_0 : i32, i32
  }
  func.func @transform_11(%arg0: i32, %arg1: i32) -> (i32, i32) {
    %c0_i32 = arith.constant 0 : i32
    %c0_i32_0 = arith.constant 0 : i32
    %c0_i32_1 = arith.constant 0 : i32
    return %c0_i32, %c0_i32_0 : i32, i32
  }
  func.func @transform_12(%arg0: i32, %arg1: i32) -> (i32, i32, i32, i32) {
    %c0_i32 = arith.constant 0 : i32
    %c0_i32_0 = arith.constant 0 : i32
    %c0_i32_1 = arith.constant 0 : i32
    return %arg0, %arg1, %c0_i32, %c0_i32_0 : i32, i32, i32, i32
  }
}

</mosaic_0001>

<bundles_post_ra>
// kernel: tpu_custom_call.1
= control target key start
LH: loop header
LB: loop body
LE: loop exit
PB: predicated region body
PF: predicated region fallthrough
CT: control target
= control target key end

     0   :  { %s5166_s0 = inlined_call_operand.hbm [shape: f32[2,16,16,128], index: 0, kind: input, shape index: {}]   ;;  %s5167_s1 = inlined_call_operand.hbm [shape: f32[2,16,16,128], index: 1, kind: input, shape index: {}]   ;;  %s5168_s2 = inlined_call_operand.hbm [shape: f32[2,16,16,128], index: 2, kind: input, shape index: {}]   ;;  %s5169_s3 = inlined_call_operand.hbm [shape: bf16[128,128], index: 3, kind: input, shape index: {}]   ;;  %s5170_s4 = inlined_call_operand.hbm [shape: bf16[3,384,128], index: 4, kind: input, shape index: {}]   ;;  %s5171_s5 = inlined_call_operand.hbm [shape: bf16[128,128], index: 5, kind: input, shape index: {}]   ;;  %s5172_s6 = inlined_call_operand.vmem [shape: f32[1,128], index: 6, kind: input, shape index: {}]   ;;  %s5173_s7 = inlined_call_operand.vmem [shape: f32[1,128], index: 7, kind: input, shape index: {}]   ;;  %s5174_s8 = inlined_call_operand.vmem [shape: f32[1,128], index: 8, kind: input, shape index: {}]   ;;  %s5175_s9 = inlined_call_operand.vmem [shape: f32[1,128], index: 9, kind: input, shape index: {}]   ;;  %s5176_s10 = inlined_call_operand.vmem [shape: f32[1,128], index: 10, kind: input, shape index: {}]   ;;  %s5177_s11 = inlined_call_operand.vmem [shape: f32[1,128], index: 11, kind: input, shape index: {}]   ;;  %s5178_s12 = inlined_call_operand.hbm [shape: f32[2,16,16,128], index: 12, kind: output, shape index: {}]  }
   0x1   :  { %5215 = sst [smem:[#allocation36_spill]] %s5166_s0 }
   0x2   :  { %5216 = sst [smem:[#allocation37_spill]] %s5167_s1 }
   0x3   :  { %5217 = sst [smem:[#allocation38_spill]] %s5168_s2 }
   0x4   :  { %5218 = sst [smem:[#allocation39_spill]] %s5169_s3 }
   0x5   :  { %5219 = sst [smem:[#allocation40_spill]] %s5170_s4 }
   0x6   :  { %5220 = sst [smem:[#allocation41_spill]] %s5171_s5 }
   0x7   :  { %5221 = sst [smem:[#allocation42_spill]] %s5172_s6 }
   0x8   :  { %5222 = sst [smem:[#allocation43_spill]] %s5173_s7 }
   0x9   :  { %5223 = sst [smem:[#allocation44_spill]] %s5174_s8 }
   0xa   :  { %5224 = sst [smem:[#allocation45_spill]] %s5175_s9 }
   0xb   :  { %5225 = sst [smem:[#allocation46_spill]] %s5176_s10 }
   0xc   :  { %5226 = sst [smem:[#allocation47_spill]] %s5177_s11 }
   0xd   :  { %5227 = sst [smem:[#allocation48_spill]] %s5178_s12 }
   0xe   :  { %17 = vsyncpa [#allocation3], 0 }
   0xf   :  { %19 = vsyncpa [#allocation3 + $0x1], 0 }
  0x10   :  { %20 = vsyncpa [#allocation6], 0 }
  0x11   :  { %22 = vsyncpa [#allocation6 + $0x1], 0 }
  0x12   :  { %23 = vsyncpa [#allocation9], 0 }
  0x13   :  { %24 = vsyncpa [#allocation12], 0 }
  0x14   :  { %25 = vsyncpa [#allocation4], 0 }
  0x15   :  { %27 = vsyncpa [#allocation4 + $0x1], 0  ;;  %s4107_s21 = smov 0   ;;  %s4109_s22 = smov 0  }
  0x16   :  { %s4111_s23 = smov 0   ;;  %s4113_s24 = smov 0  }
  0x17   :  { %s4115_s25 = smov 0   ;;  %s4117_s26 = smov 0  }
  0x18   :  { %s4119_s27 = smov 0   ;;  %s4121_s28 = smov 0  }
  0x19   :  { %s4123_s29 = smov 0   ;;  %s4125_s30 = smov 0  }
  0x1a   :  { %s4127_s13 = smov 0   ;;  %s4129_s14 = smov 0  }
  0x1b   :  { %s4131_s15 = smov 0   ;;  %s4133_s16 = smov 0  }
  0x1c LB: > { %5228 = sst [smem:[#allocation20_spill]] %s3975_s21  ;;  %s4178_s17 = sadd.s32 4294967295, %s4027_s16   ;;  %s4027_s16 = sphi %s4133_s16, %s33_s16   ;;  %s4023_s15 = sphi %s4131_s15, %s5330_s15   ;;  %s4019_s14 = sphi %s4129_s14, %s5329_s14   ;;  %s4015_s13 = sphi %s4127_s13, %s5328_s13   ;;  %s4011_s30 = sphi %s4125_s30, %s5317_s30   ;;  %s4007_s29 = sphi %s4123_s29, %s5327_s29   ;;  %s4003_s28 = sphi %s4121_s28, %s5326_s28   ;;  %s3999_s27 = sphi %s4119_s27, %s5325_s27   ;;  %s3995_s26 = sphi %s4117_s26, %s5324_s26   ;;  %s3991_s25 = sphi %s4115_s25, %s5323_s25   ;;  %s3987_s24 = sphi %s4113_s24, %s5322_s24   ;;  %s3983_s23 = sphi %s4111_s23, %s5346_s23   ;;  %s3979_s22 = sphi %s4109_s22, %s5313_s22   ;;  %s3975_s21 = sphi %s4107_s21, %s5312_s21  }
  0x1d   : > { %5229 = sst [smem:[#allocation21_spill]] %s3979_s22  ;;  %p2748_p0 = scmp.ge.s32.totalorder %s4027_s16, 1 }
  0x1e   : > { %5230 = sst [smem:[#allocation22_spill]] %s3983_s23  ;;  %p5180_p1 = scmp.eq.s32.totalorder %s4178_s17, 0 }
  0x1f   : > { %5231 = sst [smem:[#allocation23_spill]] %s3991_s25  ;;  %p367_p3 = scmp.lt.s32.totalorder %s4027_s16, 5 }
  0x20   : > { %5232 = sst [smem:[#allocation24_spill]] %s4011_s30  ;;  %s4029_s19 = smov [#allocation8]  }
  0x21   : > { %5233 = sst [smem:[#allocation25_spill]] %s4015_s13  ;;  %p4184_p4 = pnand %p2748_p0, %p367_p3 }
  0x22   : > { %5234 = sst [smem:[#allocation26_spill]] %s4019_s14  ;;  %s379_s20 = sshll.u32 %s4029_s19, 4  ;;  %s380_s20 = int_to_ptr.vmem [resolvable:$true] %s379_s20 }
  0x23   : > { %5235 = sst [smem:[#allocation27_spill]] %s4023_s15  ;;  %p3434_p5 = pneg %p4184_p4 }
  0x24   : > { %s5236_s18 = scalar_select %p4184_p4, 1, 0 }
  0x25   : > { %p4192_p6 = pnand %p3434_p5, %p5180_p1  ;;  %s5239_s3 = sld [smem:[#allocation39_spill]] }
  0x26   : > { %5237 = sst [smem:[#allocation28_spill]] %s5236_s18 }
  0x27   : > { %s5238_s12 = scalar_select %p4192_p6, 1, 0 }
  0x28   : > { %p4204_p8 = pneg %p4192_p6 }
  0x2b   : > { %s3691_s10 = scalar_lea.hbm %s5239_s3, 1024 }
  0x2c   : > { %p3692_p7 = scmp.ne.s32.totalorder %s5239_s3, %s3691_s10  ;;  %p3698_p11 = scmp.lt.u32.totalorder %s3691_s10, %s5239_s3 }
  0x2e   : > { %p3694_p9 = pnand %p4204_p8, %p3692_p7 }
  0x30   : > { %p3695_p10 = pneg %p3694_p9 }
  0x32   : > { %p3700_p12 = pnand %p3698_p11, %p3695_p10 }
  0x34   : > { %3703 = shalt.err (!%p3700_p12)
}
  0x35   : > { %s3704_s11 = scalar_lea.vmem %s380_s20, 1024  ;;  %p3712_p5 = scmp.lt.s32.totalorder %s380_s20, %s380_s20 }
  0x36   : > { %p3705_p13 = scmp.ne.s32.totalorder %s380_s20, %s3704_s11  ;;  %p3713_p2 = scmp.lt.s32.totalorder %s3704_s11, %s3704_s11 }
  0x38   : > { %p3707_p0 = pnand %p3705_p13, %p4204_p8  ;;  %p3714_p1 = por %p3713_p2, %p3712_p5 }
  0x3a   : > { %p3708_p3 = pneg %p3707_p0 }
  0x3c   : > { %p3715_p4 = pnand %p3714_p1, %p3708_p3 }
  0x3e   : > { %3718 = shalt.err (!%p3715_p4)
}
  0x3f   : > { %s5185_s8 = smov 64   ;;  %s5187_s6 = smov 4  }
  0x40   : > { %3437 = dma.hbm_to_vmem [thread:$0]  (!%p4192_p6), %s5239_s3, 1024, %s380_s20, [#allocation9], %s5185_s8, %s5185_s8, %s5187_s6  }
  0x41   : > { %s42_s10 = sadd.s32 1, %s4019_s14  ;;  %s45_s13 = sadd.s32 1, %s4023_s15 }
  0x42   : > { %p43_p1 = scmp.ge.s32.totalorder %s42_s10, 2  ;;  %p5201_p2 = scmp.eq.s32.totalorder %s4027_s16, 0 }
  0x43   : > { %s2742_s11 = sshll.u32 %s4019_s14, 3  ;;  %s90_s30 = sadd.s32 1, %s3995_s26 }
  0x44   : > { %s5332_s10 = smov (%p43_p1, %s42_s10), 0  ;;  %s5334_s13 = smov (!%p43_p1, %s45_s13), %s4023_s15 }
  0x45   : > { %5241 = sst [smem:[#allocation29_spill]] %s5332_s10  ;;  %s50_s18 = ssub.s32 %s4019_s14, %s5332_s10 }
  0x46   : > { %s2743_s2 = sadd.s32 4294967295, %s2742_s11  ;;  %p47_p4 = scmp.ge.s32.totalorder %s5334_s13, 2 }
  0x47   : > { %p79_p7 = scmp.gt.s32.totalorder %s2743_s2, 0  ;;  %s2744_s20 = sshll.u32 %s5332_s10, 3 }
  0x48   : > { %p97_p9 = scmp.ne.s32.totalorder %s3995_s26, %s3991_s25  ;;  %s5336_s13 = smov (%p47_p4, %s5334_s13), 0 }
  0x49   : > { %5242 = sst [smem:[#allocation30_spill]] %s5336_s13  ;;  %s5338_s2 = smov (!%p79_p7, %s2743_s2), 0 }
  0x4a   : > { %s4240_s7 = ssub.s32 %s4023_s15, %s5336_s13  ;;  %s2745_s9 = sadd.s32 4294967295, %s2744_s20 }
  0x4b   : > { %5243 = sst [smem:[#allocation31_spill]] %s4240_s7  ;;  %s4243_s8 = sor.u32 %s50_s18, %s4240_s7 }
  0x4c   : > { %p83_p10 = scmp.gt.s32.totalorder %s2745_s9, 0  ;;  %p4248_p12 = por %p97_p9, %p5201_p2 }
  0x4d   : > { %p103_p13 = scmp.ne.s32.totalorder %s3991_s25, %s3987_s24  ;;  %s4254_s3 = sadd.s32 8, %s2742_s11 }
  0x4e   : > { %s5340_s9 = smov (!%p83_p10, %s2745_s9), 0  ;;  %5245 = sst [smem:[#allocation32_spill]] %s4254_s3 }
  0x4f   : > { %s86_s13 = ssub.s32 %s5338_s2, %s5340_s9  ;;  %p5246_p3 = scmp.eq.s32.totalorder %s4178_s17, 0 }
  0x50   : > { %s87_s18 = sor.u32 %s86_s13, %s4240_s7  ;;  %s4264_s21 = sadd.s32 8, %s2744_s20 }
  0x51   : > { %p4260_p5 = por %p103_p13, %p5246_p3  ;;  %p88_p1 = scmp.eq.s32.totalorder %s87_s18, 0 }
  0x52   : > { %p5200_p7 = scmp.lt.s32.totalorder %s4027_s16, 4  ;;  %s4272_s11 = sshll.u32 %s4023_s15, 5 }
  0x53   : > { %s5247_s10 = scalar_select %p4260_p5, 1, 0 }
  0x54   : > { %s4269_s24 = scalar_select %p88_p1, %s3995_s26, %s90_s30  }
  0x55   : > { %5248 = sst [smem:[#allocation33_spill]] %s5247_s10  ;;  %s461_s9 = sand.u32 1, %s4027_s16  }
  0x56   : > { %s463_s13 = sand.u32 1, %s3995_s26   ;;  %s2761_s7 = sshll.u32 %s5338_s2, 1 }
  0x57   : > { %s2758_s25 = sshll.u32 %s463_s13, 4  ;;  %s475_s22 = sadd.s32 %s2761_s7, %s4272_s11 }
  0x58   : > { %s2763_s3 = sshll.u32 %s475_s22, 7  ;;  %s465_s10 = scalar_lea.vmem [#allocation5], %s2758_s25 }
  0x59   : > { %s478_s18 = sshll.u32 %s465_s10, 4  ;;  %s5249_s1 = sld [smem:[#allocation37_spill]]  ;;  %s4282_s18 = int_to_ptr.vmem [resolvable:$true] %s478_s18 }
  0x5a   : > { %p4288_p9 = pnand %p5200_p7, %p4248_p12  ;;  %s4032_s2 = smov [#allocation10]  }
  0x5b   : > { %s392_s22 = sshll.u32 %s4032_s2, 4  ;;  %s4294_s0 = scalar_lea.sflag [#allocation6], %s461_s9  ;;  %s4292_s22 = int_to_ptr.vmem [resolvable:$true] %s392_s22 }
  0x5c   : > { %p3721_p13 = pneg %p4288_p9 }
  0x5f   : > { %s4280_s20 = scalar_lea.hbm %s5249_s1, %s2763_s3  ;;  %s3724_s6 = scalar_lea.hbm %s5249_s1, 8192 }
  0x60   : > { %s3719_s3 = scalar_lea.hbm %s4280_s20, 256  ;;  %p3725_p12 = scmp.lt.u32.totalorder %s4280_s20, %s5249_s1 }
  0x61   : > { %p3720_p10 = scmp.ne.s32.totalorder %s4280_s20, %s3719_s3  ;;  %p3726_p4 = scmp.lt.u32.totalorder %s3724_s6, %s3719_s3 }
  0x62   : > { %p3728_p7 = scmp.lt.u32.totalorder %s3719_s3, %s4280_s20 }
  0x63   : > { %p3722_p3 = pnand %p3721_p13, %p3720_p10  ;;  %p3727_p0 = por %p3726_p4, %p3725_p12 }
  0x65   : > { %p3723_p1 = pneg %p3722_p3  ;;  %p3729_p2 = por %p3728_p7, %p3727_p0 }
  0x67   : > { %p3730_p11 = pnand %p3729_p2, %p3723_p1 }
  0x69   : > { %3733 = shalt.err (!%p3730_p11)
}
  0x6a   : > { %s3734_s9 = scalar_lea.vmem %s4282_s18, 256  ;;  %s4033_s13 = smov [#allocation5]  }
  0x6b   : > { %p3735_p10 = scmp.ne.s32.totalorder %s4282_s18, %s3734_s9  ;;  %s3739_s2 = sshll.u32 %s4033_s13, 4  ;;  %s3740_s2 = int_to_ptr.vmem [resolvable:$false] %s3739_s2 }
  0x6c   : > { %s3741_s23 = scalar_lea.vmem %s3740_s2, 512  ;;  %p3742_p6 = scmp.lt.s32.totalorder %s4282_s18, %s3740_s2 }
  0x6d   : > { %p3737_p3 = pnand %p3735_p10, %p3721_p13  ;;  %p3743_p4 = scmp.lt.s32.totalorder %s3741_s23, %s3734_s9 }
  0x6f   : > { %p3738_p5 = pneg %p3737_p3  ;;  %p3744_p12 = por %p3743_p4, %p3742_p6 }
  0x71   : > { %p3745_p0 = pnand %p3744_p12, %p3738_p5 }
  0x73   : > { %3748 = shalt.err (!%p3745_p0)
}
  0x74   : > { %s5205_s3 = smov 128   ;;  %s5207_s25 = smov 8  }
  0x75   : > { %3450 = dma.hbm_to_vmem [thread:$0]  (!%p4288_p9), %s4280_s20, 256, %s4282_s18, %s4294_s0, %s5205_s3, %s5205_s3, %s5207_s25  }
  0x76   : > { %s5251_s4 = sld [smem:[#allocation40_spill]] }
  0x7c   : > { %s3749_s7 = scalar_lea.hbm %s5251_s4, 9216 }
  0x7d   : > { %p3750_p6 = scmp.ne.s32.totalorder %s5251_s4, %s3749_s7  ;;  %p3756_p5 = scmp.lt.u32.totalorder %s3749_s7, %s5251_s4 }
  0x7f   : > { %p3752_p2 = pnand %p3750_p6, %p4204_p8 }
  0x81   : > { %p3753_p11 = pneg %p3752_p2 }
  0x83   : > { %p3758_p7 = pnand %p3756_p5, %p3753_p11 }
  0x85   : > { %3761 = shalt.err (!%p3758_p7)
}
  0x86   : > { %s3762_s18 = scalar_lea.vmem %s4292_s22, 9216  ;;  %p3770_p10 = scmp.lt.s32.totalorder %s4292_s22, %s4292_s22 }
  0x87   : > { %p3763_p9 = scmp.ne.s32.totalorder %s4292_s22, %s3762_s18  ;;  %p3771_p3 = scmp.lt.s32.totalorder %s3762_s18, %s3762_s18 }
  0x89   : > { %p3765_p13 = pnand %p3763_p9, %p4204_p8  ;;  %p3772_p4 = por %p3771_p3, %p3770_p10 }
  0x8b   : > { %p3766_p1 = pneg %p3765_p13 }
  0x8d   : > { %p3773_p12 = pnand %p3772_p4, %p3766_p1 }
  0x8f   : > { %3776 = shalt.err (!%p3773_p12)
}
  0x90   : > { %p5252_p0 = scmp.ne.s32.totalorder %s5238_s12, 0  ;;  %s5253_s20 = smov 4  }
  0x91   : > { %s5254_s30 = smov 64   ;;  %s4036_s7 = smov [#allocation11]  }
  0x92   : > { %3440 = dma.hbm_to_vmem [thread:$0]  (!%p5252_p0), %s5251_s4, 9216, %s4292_s22, [#allocation9], %s5254_s30, %s5254_s30, %s5253_s20  }
  0x93   : > { %s405_s9 = sshll.u32 %s4036_s7, 4  ;;  %s5255_s5 = sld [smem:[#allocation41_spill]]  ;;  %s406_s9 = int_to_ptr.vmem [resolvable:$true] %s405_s9 }
  0x99   : > { %s3777_s23 = scalar_lea.hbm %s5255_s5, 1024 }
  0x9a   : > { %p3778_p6 = scmp.ne.s32.totalorder %s5255_s5, %s3777_s23  ;;  %p3784_p5 = scmp.lt.u32.totalorder %s3777_s23, %s5255_s5 }
  0x9c   : > { %p3780_p2 = pnand %p3778_p6, %p4204_p8 }
  0x9e   : > { %p3781_p11 = pneg %p3780_p2 }
  0xa0   : > { %p3786_p7 = pnand %p3784_p5, %p3781_p11 }
  0xa2   : > { %3789 = shalt.err (!%p3786_p7)
}
  0xa3   : > { %s3790_s22 = scalar_lea.vmem %s406_s9, 1024  ;;  %p3798_p10 = scmp.lt.s32.totalorder %s406_s9, %s406_s9 }
  0xa4   : > { %p3791_p9 = scmp.ne.s32.totalorder %s406_s9, %s3790_s22  ;;  %p3799_p3 = scmp.lt.s32.totalorder %s3790_s22, %s3790_s22 }
  0xa6   : > { %p3793_p13 = pnand %p3791_p9, %p4204_p8  ;;  %p3800_p4 = por %p3799_p3, %p3798_p10 }
  0xa8   : > { %p3794_p1 = pneg %p3793_p13 }
  0xaa   : > { %p3801_p12 = pnand %p3800_p4, %p3794_p1 }
  0xac   : > { %3804 = shalt.err (!%p3801_p12)
}
  0xad   : > { %3443 = dma.hbm_to_vmem [thread:$0]  (!%p5252_p0), %s5255_s5, 1024, %s406_s9, [#allocation12], %s5254_s30, %s5254_s30, %s5253_s20  }
  0xae   : > { %s2741_s12 = sadd.s32 4294967294, %s4027_s16   ;;  %s54_s19 = sadd.s32 1, %s4007_s29 }
  0xaf   : > { %p5256_p8 = scmp.eq.s32.totalorder %s4243_s8, 0  ;;  %p61_p6 = scmp.ne.s32.totalorder %s4007_s29, %s4003_s28 }
  0xb0   : > { %p67_p2 = scmp.ne.s32.totalorder %s4003_s28, %s3999_s27  ;;  %p360_p11 = scmp.eq.s32.totalorder %s2741_s12, 3 }
  0xb1   : > { %s4377_s25 = scalar_select %p5256_p8, %s4007_s29, %s54_s19  }
  0xb2   : > { %s437_s6 = sand.u32 1, %s4007_s29   ;;  %p5258_p5 = scmp.eq.s32.totalorder %s4027_s16, 0 }
  0xb3   : > { %5257 = sst [smem:[#allocation34_spill]] %s4377_s25  ;;  %p5259_p9 = scmp.eq.s32.totalorder %s4178_s17, 0 }
  0xb4   : > { %p63_p7 = por %p5258_p5, %p61_p6  ;;  %p5261_p1 = scmp.eq.s32.totalorder %s4178_s17, 3 }
  0xb5   : > { %p4388_p13 = por %p5259_p9, %p67_p2  ;;  %p4398_p0 = por %p360_p11, %p67_p2 }
  0xb6   : > { %p4394_p10 = por %p5261_p1, %p61_p6  ;;  %s2753_s30 = sshll.u32 %s437_s6, 7 }
  0xb7   : > { %s5263_s8 = scalar_select %p4398_p0, 1, 0 }
  0xb8   : > { %s5262_s20 = scalar_select %p4394_p10, 1, 0 }
  0xb9   : > { %5264 = sst [smem:[#allocation35_spill]] %s5263_s8  ;;  %s2878_s7 = sshll.u32 %s4019_s14, 4 }
  0xba   : > { %s448_s9 = sadd.s32 %s2878_s7, %s4272_s11  ;;  %s441_s13 = scalar_lea.vmem [#allocation2], %s2753_s30 }
  0xbb   : > { %s451_s2 = sshll.u32 %s441_s13, 4  ;;  %s2757_s23 = sshll.u32 %s448_s9, 7  ;;  %s4404_s2 = int_to_ptr.vmem [resolvable:$true] %s451_s2 }
  0xbc   : > { %s5265_s1 = sld [smem:[#allocation36_spill]]  ;;  %p5266_p3 = scmp.lt.s32.totalorder %s4027_s16, 4 }
  0xbd   : > { %s4417_s19 = scalar_lea.sflag [#allocation3], %s437_s6 }
  0xbe   : > { %p4413_p4 = pnand %p5266_p3, %p63_p7 }
  0xc0   : > { %p3807_p8 = pneg %p4413_p4 }
  0xc2   : > { %s4409_s3 = scalar_lea.hbm %s5265_s1, %s2757_s23  ;;  %s3810_s13 = scalar_lea.hbm %s5265_s1, 8192 }
  0xc3   : > { %s3805_s30 = scalar_lea.hbm %s4409_s3, 2048  ;;  %p3811_p11 = scmp.lt.u32.totalorder %s4409_s3, %s5265_s1 }
  0xc4   : > { %p3806_p12 = scmp.ne.s32.totalorder %s4409_s3, %s3805_s30  ;;  %p3812_p5 = scmp.lt.u32.totalorder %s3810_s13, %s3805_s30 }
  0xc5   : > { %p3814_p9 = scmp.lt.u32.totalorder %s3805_s30, %s4409_s3 }
  0xc6   : > { %p3808_p6 = pnand %p3807_p8, %p3806_p12  ;;  %p3813_p7 = por %p3812_p5, %p3811_p11 }
  0xc8   : > { %p3809_p2 = pneg %p3808_p6  ;;  %p3815_p1 = por %p3814_p9, %p3813_p7 }
  0xca   : > { %p3816_p3 = pnand %p3815_p1, %p3809_p2 }
  0xcc   : > { %3819 = shalt.err (!%p3816_p3)
}
  0xcd   : > { %s3820_s6 = scalar_lea.vmem %s4404_s2, 2048  ;;  %s4037_s22 = smov [#allocation2]  }
  0xce   : > { %p3821_p12 = scmp.ne.s32.totalorder %s4404_s2, %s3820_s6  ;;  %s3825_s7 = sshll.u32 %s4037_s22, 4  ;;  %s3826_s7 = int_to_ptr.vmem [resolvable:$false] %s3825_s7 }
  0xcf   : > { %s3827_s9 = scalar_lea.vmem %s3826_s7, 4096  ;;  %p3828_p10 = scmp.lt.s32.totalorder %s4404_s2, %s3826_s7 }
  0xd0   : > { %p3823_p6 = pnand %p3821_p12, %p3807_p8  ;;  %p3829_p11 = scmp.lt.s32.totalorder %s3827_s9, %s3820_s6 }
  0xd2   : > { %p3824_p0 = pneg %p3823_p6  ;;  %p3830_p5 = por %p3829_p11, %p3828_p10 }
  0xd4   : > { %p3831_p7 = pnand %p3830_p5, %p3824_p0 }
  0xd6   : > { %3834 = shalt.err (!%p3831_p7)
}
  0xd7   : > { %s5268_s30 = smov 8   ;;  %s5269_s13 = smov 128  }
  0xd8   : > { %s5270_s23 = sld [smem:[#allocation22_spill]]  ;;  %s5271_s18 = sld [smem:[#allocation32_spill]] }
  0xd9   : > { %s5272_s22 = sld [smem:[#allocation21_spill]]  ;;  %s5274_s6 = sld [smem:[#allocation31_spill]] }
  0xda   : > { %s5273_s7 = sld [smem:[#allocation20_spill]]  ;;  %p5276_p0 = scmp.lt.s32.totalorder %s4264_s21, 15 }
  0xdb   : > { %3447 = dma.hbm_to_vmem [thread:$0]  (!%p4413_p4), %s4409_s3, 2048, %s4404_s2, %s4417_s19, %s5269_s13, %s5269_s13, %s5268_s30  }
  0xdc   : > { %s5344_s21 = smov (!%p5276_p0, %s4264_s21), 15  ;;  %p5277_p9 = scmp.eq.s32.totalorder %s4027_s16, 0 }
  0xdd   : > { %p5278_p12 = scmp.eq.s32.totalorder %s4178_s17, 0  ;;  %s5280_s25 = sld [smem:[#allocation38_spill]] }
  0xde   : > { %s126_s12 = sadd.s32 1, %s5270_s23  ;;  %p5275_p10 = scmp.lt.s32.totalorder %s5271_s18, 15 }
  0xdf   : > { %p133_p8 = scmp.ne.s32.totalorder %s5270_s23, %s5272_s22  ;;  %s490_s1 = sand.u32 1, %s5270_s23  }
  0xe0   : > { %s5342_s18 = smov (!%p5275_p10, %s5271_s18), 15  ;;  %p139_p2 = scmp.ne.s32.totalorder %s5272_s22, %s5273_s7 }
  0xe1   : > { %s122_s9 = ssub.s32 %s5342_s18, %s5344_s21  ;;  %p135_p1 = por %p133_p8, %p5277_p9 }
  0xe2   : > { %s123_s4 = sor.u32 %s122_s9, %s5274_s6  ;;  %p4465_p6 = por %p139_p2, %p5278_p12 }
  0xe3   : > { %p124_p3 = scmp.eq.s32.totalorder %s123_s4, 0  ;;  %s2764_s2 = sshll.u32 %s490_s1, 4 }
  0xe4   : > { %s5279_s5 = scalar_select %p4465_p6, 1, 0 }
  0xe5   : > { %s2766_s3 = sshll.u32 %s5342_s18, 1  ;;  %s5346_s23 = smov (!%p124_p3, %s5270_s23), %s126_s12 }
  0xe6   : > { %s502_s19 = sadd.s32 %s2766_s3, %s4272_s11  ;;  %s492_s14 = scalar_lea.vmem [#allocation7], %s2764_s2 }
  0xe7   : > { %s2768_s15 = sshll.u32 %s502_s19, 7  ;;  %s505_s22 = sshll.u32 %s492_s14, 4  ;;  %s4478_s22 = int_to_ptr.vmem [resolvable:$true] %s505_s22 }
  0xe8   : > { %s5281_s8 = smov %s5280_s25  ;;  %s4476_s6 = scalar_lea.hbm %s5280_s25, %s2768_s15 }
  0xe9   : > { %p5282_p4 = scmp.lt.s32.totalorder %s4027_s16, 4  ;;  %s3835_s11 = scalar_lea.hbm %s4476_s6, 256 }
  0xea   : > { %p3836_p5 = scmp.ne.s32.totalorder %s4476_s6, %s3835_s11  ;;  %s3840_s25 = scalar_lea.hbm %s5281_s8, 8192 }
  0xeb   : > { %p4482_p11 = pnand %p5282_p4, %p135_p1  ;;  %p3841_p8 = scmp.lt.u32.totalorder %s4476_s6, %s5281_s8 }
  0xec   : > { %p3842_p2 = scmp.lt.u32.totalorder %s3840_s25, %s3835_s11  ;;  %p3844_p1 = scmp.lt.u32.totalorder %s3835_s11, %s4476_s6 }
  0xed   : > { %p3837_p7 = pneg %p4482_p11 }
  0xee   : > { %p3843_p9 = por %p3842_p2, %p3841_p8 }
  0xef   : > { %p3838_p10 = pnand %p3837_p7, %p3836_p5 }
  0xf0   : > { %p3845_p3 = por %p3844_p1, %p3843_p9 }
  0xf1   : > { %p3839_p0 = pneg %p3838_p10 }
  0xf3   : > { %p3846_p12 = pnand %p3845_p3, %p3839_p0 }
  0xf5   : > { %3849 = shalt.err (!%p3846_p12)
}
  0xf6   : > { %s3850_s12 = scalar_lea.vmem %s4478_s22, 256  ;;  %s4038_s9 = smov [#allocation7]  }
  0xf7   : > { %p3851_p4 = scmp.ne.s32.totalorder %s4478_s22, %s3850_s12  ;;  %s3855_s2 = sshll.u32 %s4038_s9, 4  ;;  %s3856_s2 = int_to_ptr.vmem [resolvable:$false] %s3855_s2 }
  0xf8   : > { %s3857_s3 = scalar_lea.vmem %s3856_s2, 512  ;;  %p3858_p6 = scmp.lt.s32.totalorder %s4478_s22, %s3856_s2 }
  0xf9   : > { %p3853_p5 = pnand %p3851_p4, %p3837_p7  ;;  %p3859_p8 = scmp.lt.s32.totalorder %s3857_s3, %s3850_s12 }
  0xfb   : > { %p3854_p10 = pneg %p3853_p5  ;;  %p3860_p2 = por %p3859_p8, %p3858_p6 }
  0xfd   : > { %p3861_p9 = pnand %p3860_p2, %p3854_p10 }
  0xff   : > { %3864 = shalt.err (!%p3861_p9)
}
 0x100   : > { %3453 = dma.hbm_to_vmem [thread:$0]  (!%p4482_p11), %s4476_s6, 256, %s4478_s22, %s4294_s0, %s5269_s13, %s5269_s13, %s5268_s30  }
 0x101   : > { %s5284_s19 = sld [smem:[#allocation28_spill]] }
 0x107   : > { %p5285_p7 = scmp.ne.s32.totalorder %s5284_s19, 0 }
 0x108   : > { %s4518_s7 = sand.u32 (!%p5285_p7), 1, %s4003_s28  }
 0x109   : > { %517 = sbr.rel (%p5285_p7) target bundleno = 1187 (0x4a3), region = 68  ;;  %s2770_s21 = sshll.u32 (!%p5285_p7), %s4518_s7, 7 }
 0x10a   : > { %s520_s11 = scalar_lea.sflag (!%p5285_p7), [#allocation3], %s4518_s7  ;;  %s4524_s4 = scalar_lea.vmem (!%p5285_p7), [#allocation2], %s2770_s21 }
 0x110   : > { %3950 = dma.done.wait (%p4388_p13), %s520_s11, 2048  }
 0x111   : > { %3952 = vsyncadd (%p4388_p13), %s520_s11, 4294965248  ;;  %s5286_s0 = sld [smem:[#allocation23_spill]]  ;;  %s5287_s30 = sld [smem:[#allocation33_spill]] }
 0x112   : > { %s528_s13 = sand.u32 1, %s4178_s17  }
 0x113   : > { %s529_s14 = scalar_lea.sflag [#allocation6], %s528_s13 }
 0x117   : > { %s530_s22 = sand.u32 1, %s5286_s0   ;;  %p5288_p6 = scmp.ne.s32.totalorder %s5287_s30, 0 }
 0x118   : > { %s2771_s6 = sshll.u32 %s530_s22, 4 }
 0x119   : > { %s532_s15 = scalar_lea.vmem [#allocation5], %s2771_s6 }
 0x11a   : > { %3954 = dma.done.wait (%p5288_p6), %s529_s14, 256  }
 0x11b   : > { %3956 = vsyncadd (%p5288_p6), %s529_s14, 4294967040  ;;  %s5289_s25 = sld [smem:[#allocation21_spill]]  ;;  %p5290_p13 = scmp.ne.s32.totalorder %s5279_s5, 0 }
 0x121   : > { %s539_s1 = sand.u32 1, %s5289_s25  }
 0x122   : > { %s4537_s18 = sshll.u32 %s539_s1, 4 }
 0x123   : > { %s541_s10 = scalar_lea.vmem [#allocation7], %s4537_s18 }
 0x124   : > { %3958 = dma.done.wait (%p5290_p13), %s529_s14, 256  }
 0x125   : > { %3960 = vsyncadd (%p5290_p13), %s529_s14, 4294967040  ;;  %p5291_p11 = scmp.eq.s32.totalorder %s4178_s17, 0 }
 0x127   : > { %3962 = dma.done.wait (%p5291_p11), [#allocation9], 10240   ;;  %p5292_p0 = pmov %p5291_p11 }
 0x129   : > { %3964 = vsyncadd (%p5292_p0), [#allocation9], 4294957056  ;;  %p5293_p1 = pmov %p5292_p0 }
 0x12a   : > { %p5294_p3 = pmov %p5292_p0 }
 0x12b   : > { %3966 = dma.done.wait (%p5293_p1), [#allocation12], 1024  }
 0x12c   : > { %3968 = vsyncadd (%p5294_p3), [#allocation12], 4294966272  ;;  %v3587_v0 = vld [vmem:[#allocation8] sm:$0xff]   ;;  %v3588_v1 = vld [vmem:[#allocation8 + $0x8] sm:$0xff]   ;;  %s5295_s5 = sld [smem:[#allocation24_spill]]  ;;  %s5297_s11 = sld [smem:[#allocation43_spill]] }
 0x12d   : > { %3154 = vmatprep.subr.bf16.mxu0 %v3587_v0  ;;  %3318 = vmatprep.subr.bf16.mxu1 %v3587_v0  ;;  %v3589_v2 = vld [vmem:[#allocation8 + $0x10] sm:$0xff]   ;;  %v3590_v3 = vld [vmem:[#allocation8 + $0x18] sm:$0xff]   ;;  %v3591_v7 = vld [vmem:[#allocation8 + $0x20] sm:$0xff]   ;;  %s5296_s9 = sld [smem:[#allocation42_spill]]  ;;  %vm998_vm0 = vcmask 1040384   ;;  %vm1041_vm2 = vcmask 1047552  }
 0x12e   : > { %3155 = vmatpush3.bf16.msra.mxu0 %v3587_v0  ;;  %3326 = vmatpush3.bf16.msra.mxu1 %v3587_v0  ;;  %v615_v4 = vld [vmem:[%s532_s15] sm:$0xff]  ;;  %v616_v5 = vld [vmem:[%s532_s15 + $0x8] sm:$0xff]  ;;  %vm999_vm1 = vsmask.f32 256  ;;  %vm1042_vm3 = vsmask.f32 7424 }
 0x12f   : > { %3156 = vmatprep.subr.bf16.mxu0 %v3588_v1  ;;  %3319 = vmatprep.subr.bf16.mxu1 %v3588_v1  ;;  %v635_v6 = vpack.c.bf16 %v616_v5, %v615_v4  ;;  %v631_v8 = vld [vmem:[%s4524_s4 + $0x70] sm:$0xff]  ;;  %v632_v9 = vld [vmem:[%s4524_s4 + $0x78] sm:$0xff]  ;;  %v3592_v11 = vld [vmem:[#allocation8 + $0x28] sm:$0xff]   ;;  %s5302_s14 = sld [smem:[#allocation44_spill]]  ;;  %s5303_s1 = sld [smem:[#allocation45_spill]] }
 0x130   : > { %v643_v10 = vpack.c.bf16 %v632_v9, %v631_v8  ;;  %v3593_v12 = vld [vmem:[#allocation8 + $0x30] sm:$0xff]   ;;  %v3594_v13 = vld [vmem:[#allocation8 + $0x38] sm:$0xff]   ;;  %v617_v14 = vld [vmem:[%s4524_s4] sm:$0xff]  ;;  %s5304_s17 = sld [smem:[#allocation46_spill]]  ;;  %s5026_s3 = scalar_lea.vmem [#allocation13], %s2770_s21 }
 0x131   : > { %3170 = vmatprep.mubr.bf16.mxu0 %v635_v6  ;;  %v618_v15 = vld [vmem:[%s4524_s4 + $0x8] sm:$0xff]  ;;  %v619_v16 = vld [vmem:[%s4524_s4 + $0x10] sm:$0xff]  ;;  %v620_v17 = vld [vmem:[%s4524_s4 + $0x18] sm:$0xff]  ;;  %s5306_s21 = sld [smem:[#allocation25_spill]]  ;;  %s5307_s6 = sld [smem:[#allocation48_spill]] }
 0x132   : > { %3157 = vmatpush3.bf16.msra.mxu0 %v3588_v1  ;;  %3327 = vmatpush3.bf16.msra.mxu1 %v3588_v1  ;;  %v633_v18 = vld [vmem:[%s541_s10] sm:$0xff]  ;;  %v634_v19 = vld [vmem:[%s541_s10 + $0x8] sm:$0xff]  ;;  %v636_v22 = vpack.c.bf16 %v618_v15, %v617_v14  ;;  %v637_v24 = vpack.c.bf16 %v620_v17, %v619_v16  ;;  %p896_p12 = scmp.gt.s32.totalorder %s5295_s5, 0  ;;  %p899_p4 = scmp.lt.s32.totalorder %s5295_s5, 1  ;;  %vm4625_vm4 = vmand %vm998_vm0, %vm999_vm1 }
 0x133   : > { %3158 = vmatprep.subr.bf16.mxu0 %v3589_v2  ;;  %3320 = vmatprep.subr.bf16.mxu1 %v3589_v2  ;;  %v3600_v20 = vld [vmem:[#allocation10 + $0x140] sm:$0xff]   ;;  %v644_v25 = vpack.c.bf16 %v634_v19, %v633_v18  ;;  %v3597_v26 = vld [vmem:[#allocation10 + $0x108] sm:$0xff]   ;;  %v623_v30 = vld [vmem:[%s4524_s4 + $0x30] sm:$0xff]  ;;  %s2879_s19 = sshll.u32 %s5295_s5, 4  ;;  %s2556_s15 = scalar_lea.sflag [#allocation4], %s4518_s7 }
 0x134   : > { %3186 = vmatprep.mubr.bf16.mxu1 %v643_v10  ;;  %v3595_v21 = vld [vmem:[#allocation10 + $0x100] sm:$0xff]   ;;  %v3603_v27 = vld [vmem:[#allocation10 + $0x148] sm:$0xff]   ;;  %v624_v31 = vld [vmem:[%s4524_s4 + $0x38] sm:$0xff]  ;;  %s897_s2 = scalar_select %p896_p12, 1, 0 }
 0x135   : > { %v3596_v23 = vld [vmem:[#allocation10 + $0xc0] sm:$0xff]   ;;  %v622_v29 = vld [vmem:[%s4524_s4 + $0x28] sm:$0xff]  ;;  %v3599_v33 = vld [vmem:[#allocation10 + $0x110] sm:$0xff]   ;;  %v639_v36 = vpack.c.bf16 %v624_v31, %v623_v30  ;;  %s4638_s30 = scalar_select %p899_p4, 1, 0 }
 0x136   : > { %3159 = vmatpush3.bf16.msra.mxu0 %v3589_v2  ;;  %3328 = vmatpush3.bf16.msra.mxu1 %v3589_v2  ;;  %v621_v28 = vld [vmem:[%s4524_s4 + $0x20] sm:$0xff]  ;;  %v3598_v32 = vld [vmem:[#allocation10 + $0xc8] sm:$0xff]   ;;  %v3601_v35 = vld [vmem:[#allocation10 + $0xd0] sm:$0xff]   ;;  %s898_s0 = scvt.s32.f32 %s897_s2  ;;  %s5305_s2 = sld [smem:[#allocation47_spill]] }
 0x137   : > { %3160 = vmatprep.subr.bf16.mxu0 %v3590_v3  ;;  %3321 = vmatprep.subr.bf16.mxu1 %v3590_v3  ;;  %v638_v34 = vpack.c.bf16 %v622_v29, %v621_v28  ;;  %v3602_v37 = vld [vmem:[#allocation10 + $0x118] sm:$0xff]   ;;  %v625_v38 = vld [vmem:[%s4524_s4 + $0x40] sm:$0xff]  ;;  %v626_v39 = vld [vmem:[%s4524_s4 + $0x48] sm:$0xff]  ;;  %s901_s13 = scvt.s32.f32 %s4638_s30  ;;  %p5308_p10 = scmp.ne.s32.totalorder %s5262_s20, 0 }
 0x138   : > { %v627_v40 = vld [vmem:[%s4524_s4 + $0x50] sm:$0xff]  ;;  %v628_v41 = vld [vmem:[%s4524_s4 + $0x58] sm:$0xff]  ;;  %v640_v43 = vpack.c.bf16 %v626_v39, %v625_v38  ;;  %v629_v45 = vld [vmem:[%s4524_s4 + $0x60] sm:$0xff] }
 0x139   : > { %v3604_v42 = vld [vmem:[#allocation10 + $0xd8] sm:$0xff]   ;;  %v641_v44 = vpack.c.bf16 %v628_v41, %v627_v40  ;;  %v630_v46 = vld [vmem:[%s4524_s4 + $0x68] sm:$0xff]  ;;  %v3605_v48 = vld [vmem:[#allocation10 + $0x120] sm:$0xff]  }
 0x13a   : > { %3161 = vmatpush3.bf16.msra.mxu0 %v3590_v3  ;;  %3329 = vmatpush3.bf16.msra.mxu1 %v3590_v3  ;;  %v642_v47 = vpack.c.bf16 %v630_v46, %v629_v45  ;;  %v3606_v49 = vld [vmem:[#allocation10 + $0x150] sm:$0xff]   ;;  %v3607_v50 = vld [vmem:[#allocation10 + $0xe0] sm:$0xff]   ;;  %v3608_v51 = vld [vmem:[#allocation10 + $0x128] sm:$0xff]  }
 0x13b   : > { %3162 = vmatprep.subr.bf16.mxu0 %v3591_v7  ;;  %3322 = vmatprep.subr.bf16.mxu1 %v3591_v7  ;;  %v3609_v52 = vld [vmem:[#allocation10 + $0x158] sm:$0xff]   ;;  %v3610_v53 = vld [vmem:[#allocation10 + $0xe8] sm:$0xff]   ;;  %v3611_v54 = vld [vmem:[#allocation10 + $0x130] sm:$0xff]  }
 0x13c   : > { %v3612_v55 = vld [vmem:[#allocation10 + $0x160] sm:$0xff]   ;;  %v3613_v56 = vld [vmem:[#allocation10 + $0xf0] sm:$0xff]   ;;  %v3614_v57 = vld [vmem:[#allocation10 + $0x138] sm:$0xff]  }
 0x13d   : > { %v3615_v58 = vld [vmem:[#allocation10 + $0x168] sm:$0xff]   ;;  %v3616_v59 = vld [vmem:[#allocation10 + $0xf8] sm:$0xff]   ;;  %v3617_v60 = vld [vmem:[#allocation10 + $0x170] sm:$0xff]  }
 0x13e   : > { %3163 = vmatpush3.bf16.msra.mxu0 %v3591_v7  ;;  %3330 = vmatpush3.bf16.msra.mxu1 %v3591_v7  ;;  %v3618_v61 = vld [vmem:[#allocation10 + $0x178] sm:$0xff]   ;;  %v4572_v62 = vld [vmem:[#allocation10 + $0x80] sm:$0xff]   ;;  %vm4632_vm5 = vmand %vm1041_vm2, %vm1042_vm3 }
 0x13f   : > { %3164 = vmatprep.subr.bf16.mxu0 %v3592_v11  ;;  %3323 = vmatprep.subr.bf16.mxu1 %v3592_v11  ;;  %v3626_v63 = vld [vmem:[#allocation10 + $0x40] sm:$0xff]  }
 0x140   : > { %v4579_v0 = vld [vmem:[%s5296_s9] ss:$0 sm:$0xff] }
 0x141   : > { %v4584_v2 = vld [vmem:[%s5297_s11] ss:$0 sm:$0xff]  ;;  %s2874_s11 = sshll.u32 %s5306_s21, 5 }
 0x142   : > { %3165 = vmatpush3.bf16.msra.mxu0 %v3592_v11  ;;  %3331 = vmatpush3.bf16.msra.mxu1 %v3592_v11  ;;  %s2569_s5 = sadd.s32 %s2879_s19, %s2874_s11 }
 0x143   : > { %3166 = vmatprep.subr.bf16.mxu0 %v3593_v12  ;;  %3324 = vmatprep.subr.bf16.mxu1 %v3593_v12  ;;  %s2875_s30 = sshll.u32 %s2569_s5, 7 }
 0x146   : > { %3167 = vmatpush3.bf16.msra.mxu0 %v3593_v12  ;;  %3332 = vmatpush3.bf16.msra.mxu1 %v3593_v12 }
 0x147   : > { %3168 = vmatprep.subr.bf16.mxu0 %v3594_v13  ;;  %3325 = vmatprep.subr.bf16.mxu1 %v3594_v13 }
 0x14a   : > { %3169 = vmatpush3.bf16.msra.mxu0 %v3594_v13  ;;  %3333 = vmatpush3.bf16.msra.mxu1 %v3594_v13 }
 0x14b   : > { %3190 = vmatprep.subr.bf16.mxu0 %v3600_v20  ;;  %2898 = vmatprep.subr.bf16.mxu1 %v3595_v21 }
 0x14d   : > { %3171 = vmatmul.mubr.bf16.vlgmr.msra.gmra.mrb[0].mxu0 %v636_v22  ;;  %3187 = vmatmul.mubr.bf16.vlgmr.msra.gmra.mrb[0].mxu1 %v644_v25 }
 0x14e   : > { %3174 = vmatprep.mubr.bf16.mxu0 %v637_v24  ;;  %2899 = vmatpush3.bf16.msra.mxu1 %v3596_v23 }
 0x14f   : > { %3191 = vmatpush3.bf16.msra.mxu0 %v3600_v20  ;;  %2900 = vmatprep.subr.bf16.mxu1 %v3597_v26 }
 0x150   : > { %3192 = vmatprep.subr.bf16.mxu0 %v3603_v27 }
 0x152   : > { %2901 = vmatpush3.bf16.msra.mxu1 %v3598_v32 }
 0x153   : > { %3193 = vmatpush3.bf16.msra.mxu0 %v3603_v27  ;;  %2902 = vmatprep.subr.bf16.mxu1 %v3599_v33  ;;  %v902_v27 = vstv %s898_s0  ;;  %s2572_s0 = sshll.u32 %s5026_s3, 4  ;;  %s5080_s0 = int_to_ptr.vmem [resolvable:$true] %s2572_s0 }
 0x154   : > { %3194 = vmatprep.subr.bf16.mxu0 %v3606_v49  ;;  %s3865_s25 = scalar_lea.vmem %s5080_s0, 2048 }
 0x155   : > { %3175 = vmatmul.mubr.bf16.gmra.mrb[4].mxu0 %v638_v34  ;;  %p3866_p5 = scmp.ne.s32.totalorder %s5080_s0, %s3865_s25 }
 0x156   : > { %3178 = vmatprep.mubr.bf16.mxu0 %v639_v36  ;;  %2903 = vmatpush3.bf16.msra.mxu1 %v3601_v35 }
 0x157   : > { %2904 = vmatprep.subr.bf16.mxu1 %v3602_v37  ;;  %3195 = vmatpush3.bf16.msra.mxu0 %v3606_v49  ;;  %p3867_p8 = pnand %p3866_p5, %p5308_p10 }
 0x158   : > { %3196 = vmatprep.subr.bf16.mxu0 %v3609_v52 }
 0x159   : > { %p3868_p2 = pneg %p3867_p8 }
 0x15a   : > { %2905 = vmatpush3.bf16.msra.mxu1 %v3604_v42 }
 0x15b   : > { %2906 = vmatprep.subr.bf16.mxu1 %v3605_v48  ;;  %3197 = vmatpush3.bf16.msra.mxu0 %v3609_v52  ;;  %v3668_v52 = vld [vmem:[#allocation11 + $0x8] sm:$0xff]  }
 0x15c   : > { %3198 = vmatprep.subr.bf16.mxu0 %v3612_v55 }
 0x15d   : > { %3179 = vmatmul.mubr.bf16.gmra.mrb[8].mxu0 %v640_v43 }
 0x15e   : > { %3182 = vmatprep.mubr.bf16.mxu0 %v641_v44  ;;  %2907 = vmatpush3.bf16.msra.mxu1 %v3607_v50 }
 0x15f   : > { %2908 = vmatprep.subr.bf16.mxu1 %v3608_v51  ;;  %3199 = vmatpush3.bf16.msra.mxu0 %v3612_v55 }
 0x160   : > { %3200 = vmatprep.subr.bf16.mxu0 %v3615_v58 }
 0x162   : > { %2909 = vmatpush3.bf16.msra.mxu1 %v3610_v53 }
 0x163   : > { %2910 = vmatprep.subr.bf16.mxu1 %v3611_v54  ;;  %3201 = vmatpush3.bf16.msra.mxu0 %v3615_v58 }
 0x164   : > { %3202 = vmatprep.subr.bf16.mxu0 %v3617_v60 }
 0x165   : > { %3183 = vmatmul.mubr.bf16.gmra.mrb[12].mxu0 %v642_v47 }
 0x166   : > { %2911 = vmatpush3.bf16.msra.mxu1 %v3613_v56 }
 0x167   : > { %2912 = vmatprep.subr.bf16.mxu1 %v3614_v57  ;;  %3203 = vmatpush3.bf16.msra.mxu0 %v3617_v60  ;;  %v3627_v60 = vld [vmem:[#allocation10] sm:$0xff]  }
 0x168   : > { %3204 = vmatprep.subr.bf16.mxu0 %v3618_v61 }
 0x16a   : > { %2913 = vmatpush3.bf16.msra.mxu1 %v3616_v59 }
 0x16b   : > { %3205 = vmatpush3.bf16.msra.mxu0 %v3618_v61  ;;  %2978 = vmatprep.subr.bf16.mxu1 %v3626_v63 }
 0x16c   : > { %3222 = vmatprep.subr.bf16.mxu0 %v4572_v62 }
 0x220   : > { %v3172_v1 = vpop.f32.mrb[0].mxu0  ;;  %v3188_v5 = vpop.f32.mrb[0].mxu1 }
 0x221   : > { %v831_v3 = vmul.f32 %v3172_v1, %v4579_v0  ;;  %v743_v4 = vpop.f32.mrb[1].mxu0  ;;  %v847_v8 = vmul.f32 %v3188_v5, %v4579_v0  ;;  %v807_v9 = vpop.f32.mrb[1].mxu1 }
 0x222   : > { %v829_v6 = vmul.f32 %v4579_v0, %v743_v4  ;;  %v3173_v7 = vpop.f32.mrb[2].mxu0  ;;  %v845_v13 = vmul.f32 %v4579_v0, %v807_v9  ;;  %v3189_v14 = vpop.f32.mrb[2].mxu1 }
 0x223   : > { %v858_v10 = vadd.f32 %v4584_v2, %v831_v3  ;;  %v832_v11 = vmul.f32 %v3173_v7, %v4579_v0  ;;  %v746_v12 = vpop.f32.mrb[3].mxu0  ;;  %v4595_v17 = vadd.f32 %v4584_v2, %v847_v8  ;;  %v848_v18 = vmul.f32 %v3189_v14, %v4579_v0  ;;  %v810_v19 = vpop.f32.mrb[3].mxu1  ;;  %v3629_v3 = vld [vmem:[#allocation10 + $0x48] sm:$0xff]  }
 0x224   : > { %v856_v15 = vadd.f32 %v4584_v2, %v829_v6  ;;  %v830_v16 = vmul.f32 %v4579_v0, %v746_v12  ;;  %v872_v21 = vadd.f32 %v4584_v2, %v845_v13  ;;  %v846_v22 = vmul.f32 %v4579_v0, %v810_v19 }
 0x225   : > { %v859_v20 = vadd.f32 %v4584_v2, %v832_v11  ;;  %v4603_v25 = vadd.f32 %v4584_v2, %v848_v18  ;;  %v878_v26 = vmax.f32 %v858_v10, 0.0 }
 0x226   : > { %v876_v23 = vmax.f32 %v856_v15, 0.0  ;;  %v857_v24 = vadd.f32 %v4584_v2, %v830_v16  ;;  %v873_v29 = vadd.f32 %v4584_v2, %v846_v22  ;;  %v892_v32 = vmax.f32 %v872_v21, 0.0  ;;  %v3630_v16 = vld [vmem:[#allocation10 + $0x8] sm:$0xff]   ;;  %v3632_v22 = vld [vmem:[#allocation10 + $0x50] sm:$0xff]  }
 0x227   : > { %v879_v28 = vmax.f32 %v859_v20, 0.0 }
 0x228   : > { %v877_v30 = vmax.f32 %v857_v24, 0.0  ;;  %v3176_v31 = vpop.f32.mrb[4].mxu0  ;;  %v893_v36 = vmax.f32 %v873_v29, 0.0  ;;  %v903_v37 = vmul.f32 %v902_v27, %v876_v23 }
 0x229   : > { %v4606_v33 = vpack.c.bf16 %v879_v28, %v878_v26  ;;  %v835_v34 = vmul.f32 %v3176_v31, %v4579_v0  ;;  %v759_v35 = vpop.f32.mrb[5].mxu0  ;;  %v905_v28 = vstv %s901_s13 }
 0x22a   : > { %v904_v38 = vmul.f32 %v902_v27, %v877_v30  ;;  %v833_v39 = vmul.f32 %v4579_v0, %v759_v35  ;;  %v3177_v40 = vpop.f32.mrb[6].mxu0  ;;  %v4620_v49 = vpack.c.bf16 %v893_v36, %v892_v32  ;;  %v894_v35 = vmax.f32 %v4595_v17, 0.0 }
 0x22b   : > { %v862_v41 = vadd.f32 %v4584_v2, %v835_v34  ;;  %v836_v42 = vmul.f32 %v3177_v40, %v4579_v0  ;;  %v762_v43 = vpop.f32.mrb[7].mxu0  ;;  %1327 = vmatprep.mubr.bf16.mxu1 %v4606_v33  ;;  %v926_v44 = vshrl.u32 %v4606_v33, 16  ;;  %v929_v45 = vshll.u32 %v4606_v33, 16 }
 0x22c   : > { %v4616_v46 = vpack.c.bf16 %v904_v38, %v903_v37  ;;  %v860_v47 = vadd.f32 %v4584_v2, %v833_v39  ;;  %v834_v48 = vmul.f32 %v4579_v0, %v762_v43 }
 0x22d   : > { %v863_v50 = vadd.f32 %v4584_v2, %v836_v42  ;;  %v928_v51 = vrot.slane %v926_v44, 7  ;;  %v1013_v53 = vrot.slane %v929_v45, 1  ;;  %v882_v56 = vmax.f32 %v862_v41, 0.0 }
 0x22e   : > { %v861_v54 = vadd.f32 %v4584_v2, %v834_v48  ;;  %v880_v61 = vmax.f32 %v860_v47, 0.0 }
 0x22f   : > { %v883_v57 = vmax.f32 %v863_v50, 0.0  ;;  %v931_v58 = vor.u32 %v929_v45, %v928_v51  ;;  %v1014_v59 = vor.u32 %v1013_v53, %v926_v44  ;;  %v895_v44 = vmax.f32 %v4603_v25, 0.0  ;;  %v3620_v45 = vld [vmem:[#allocation10 + $0x88] sm:$0xff]  }
 0x230   : > { %v881_v63 = vmax.f32 %v861_v54, 0.0  ;;  %v3180_v1 = vpop.f32.mrb[8].mxu0  ;;  %v3634_v54 = vld [vmem:[#allocation10 + $0x10] sm:$0xff]  }
 0x231   : > { %v4640_v4 = vpack.c.bf16 %v883_v57, %v882_v56  ;;  %v839_v5 = vmul.f32 %v3180_v1, %v4579_v0  ;;  %v775_v6 = vpop.f32.mrb[9].mxu0  ;;  %v4645_v7 = vsel %vm4625_vm4, 0, %v931_v58  ;;  %v4649_v8 = vsel %vm4632_vm5, %v1014_v59, 0 }
 0x232   : > { %v4651_v9 = vpack.c.bf16 %v881_v63, %v880_v61  ;;  %v837_v10 = vmul.f32 %v4579_v0, %v775_v6  ;;  %v3181_v11 = vpop.f32.mrb[10].mxu0  ;;  %1328 = vmatmul.mubr.bf16.vlgmr.msra.gmra.mrb[4].mxu1 %v4645_v7  ;;  %3206 = vmatprep.mubr.bf16.mxu0 %v4649_v8  ;;  %v919_v59 = vshrl.u32 %v4616_v46, 16  ;;  %v906_v6 = vmul.f32 %v905_v28, %v894_v35  ;;  %v3642_v35 = vld [vmem:[#allocation10 + $0x20] sm:$0xff]  }
 0x233   : > { %v866_v12 = vadd.f32 %v4584_v2, %v839_v5  ;;  %v840_v13 = vmul.f32 %v3181_v11, %v4579_v0  ;;  %v778_v14 = vpop.f32.mrb[11].mxu0  ;;  %v943_v15 = vshll.u32 %v4640_v4, 16  ;;  %2979 = vmatpush3.bf16.msra.mxu1 %v3627_v60  ;;  %v940_v24 = vshrl.u32 %v4640_v4, 16  ;;  %v3636_v60 = vld [vmem:[#allocation10 + $0x58] sm:$0xff]  }
 0x234   : > { %v864_v18 = vadd.f32 %v4584_v2, %v837_v10  ;;  %v838_v19 = vmul.f32 %v4579_v0, %v778_v14  ;;  %1335 = vmatprep.mubr.bf16.mxu1 %v4651_v9  ;;  %v933_v20 = vshrl.u32 %v4651_v9, 16  ;;  %v936_v21 = vshll.u32 %v4651_v9, 16  ;;  %2980 = vmatprep.subr.bf16.mxu1 %v3629_v3  ;;  %v3621_v10 = vld [vmem:[#allocation10 + $0x90] sm:$0xff]  }
 0x235   : > { %v867_v23 = vadd.f32 %v4584_v2, %v840_v13  ;;  %v1017_v26 = vrot.slane %v943_v15, 1  ;;  %v886_v31 = vmax.f32 %v866_v12, 0.0  ;;  %v942_v47 = vrot.slane %v940_v24, 7 }
 0x236   : > { %v865_v27 = vadd.f32 %v4584_v2, %v838_v19  ;;  %v935_v29 = vrot.slane %v933_v20, 7  ;;  %v1015_v30 = vrot.slane %v936_v21, 1  ;;  %v884_v32 = vmax.f32 %v864_v18, 0.0 }
 0x237   : > { %v887_v34 = vmax.f32 %v867_v23, 0.0  ;;  %2981 = vmatpush3.bf16.msra.mxu1 %v3630_v16  ;;  %v1018_v40 = vor.u32 %v1017_v26, %v940_v24  ;;  %v945_v12 = vor.u32 %v943_v15, %v942_v47  ;;  %v3638_v16 = vld [vmem:[#allocation10 + $0x18] sm:$0xff]  }
 0x238   : > { %v885_v36 = vmax.f32 %v865_v27, 0.0  ;;  %v3184_v37 = vpop.f32.mrb[12].mxu0  ;;  %v938_v38 = vor.u32 %v936_v21, %v935_v29  ;;  %v1016_v39 = vor.u32 %v1015_v30, %v933_v20  ;;  %2982 = vmatprep.subr.bf16.mxu1 %v3632_v22  ;;  %v907_v20 = vmul.f32 %v905_v28, %v895_v44 }
 0x239   : > { %v4669_v41 = vpack.c.bf16 %v887_v34, %v886_v31  ;;  %v843_v42 = vmul.f32 %v3184_v37, %v4579_v0  ;;  %v791_v43 = vpop.f32.mrb[13].mxu0  ;;  %v4696_v1 = vsel %vm4632_vm5, %v1018_v40, 0  ;;  %v921_v21 = vrot.slane %v919_v59, 7 }
 0x23a   : > { %v4673_v48 = vpack.c.bf16 %v885_v36, %v884_v32  ;;  %v841_v17 = vmul.f32 %v4579_v0, %v791_v43  ;;  %v3185_v50 = vpop.f32.mrb[14].mxu0  ;;  %v4678_v51 = vsel %vm4625_vm4, 0, %v938_v38  ;;  %v4682_v53 = vsel %vm4632_vm5, %v1016_v39, 0  ;;  %v3640_v32 = vld [vmem:[#allocation10 + $0x60] sm:$0xff]  }
 0x23b   : > { %v870_v56 = vadd.f32 %v4584_v2, %v843_v42  ;;  %v844_v25 = vmul.f32 %v3185_v50, %v4579_v0  ;;  %v794_v57 = vpop.f32.mrb[15].mxu0  ;;  %1336 = vmatmul.mubr.bf16.gmra.mrb[8].mxu1 %v4678_v51  ;;  %3207 = vmatmul.mubr.bf16.vlgmr.msra.gmra.mrb[16].mxu0 %v4682_v53  ;;  %v957_v58 = vshll.u32 %v4669_v41, 16  ;;  %v954_v14 = vshrl.u32 %v4669_v41, 16  ;;  %v3644_v42 = vld [vmem:[#allocation10 + $0x68] sm:$0xff]   ;;  %v3623_v43 = vld [vmem:[#allocation10 + $0xa0] sm:$0xff]  }
 0x23c   : > { %v868_v61 = vadd.f32 %v4584_v2, %v841_v17  ;;  %v842_v63 = vmul.f32 %v4579_v0, %v794_v57  ;;  %3223 = vmatpush3.bf16.msra.mxu0 %v4572_v62  ;;  %1343 = vmatprep.mubr.bf16.mxu1 %v4640_v4  ;;  %v950_v3 = vshll.u32 %v4673_v48, 16  ;;  %v947_v11 = vshrl.u32 %v4673_v48, 16 }
 0x23d   : > { %v871_v5 = vadd.f32 %v4584_v2, %v844_v25  ;;  %3210 = vmatprep.mubr.bf16.mxu0 %v4696_v1  ;;  %3224 = vmatprep.subr.bf16.mxu0 %v3620_v45  ;;  %v1021_v62 = vrot.slane %v957_v58, 1  ;;  %v890_v18 = vmax.f32 %v870_v56, 0.0  ;;  %v922_v29 = vshll.u32 %v4616_v46, 16 }
 0x23e   : > { %v869_v0 = vadd.f32 %v4584_v2, %v842_v63  ;;  %v1019_v13 = vrot.slane %v950_v3, 1  ;;  %2983 = vmatpush3.bf16.msra.mxu1 %v3634_v54  ;;  %v888_v22 = vmax.f32 %v868_v61, 0.0  ;;  %v3622_v2 = vld [vmem:[#allocation10 + $0x98] sm:$0xff]   ;;  %v949_v15 = vrot.slane %v947_v11, 7 }
 0x23f   : > { %v891_v19 = vmax.f32 %v871_v5, 0.0  ;;  %2984 = vmatprep.subr.bf16.mxu1 %v3636_v60  ;;  %v1022_v26 = vor.u32 %v1021_v62, %v954_v14  ;;  %v4715_v28 = vsel %vm4625_vm4, 0, %v945_v12  ;;  %v4724_v36 = vor.u32 %v922_v29, %v921_v21  ;;  %v3625_v21 = vld [vmem:[#allocation10 + $0xb0] sm:$0xff]  }
 0x240   : > { %v889_v23 = vmax.f32 %v869_v0, 0.0  ;;  %3225 = vmatpush3.bf16.msra.mxu0 %v3620_v45  ;;  %v1020_v24 = vor.u32 %v1019_v13, %v947_v11  ;;  %v4726_v37 = vpack.c.bf16 %v907_v20, %v906_v6  ;;  %v978_v40 = vshll.u32 %v4620_v49, 16  ;;  %v3646_v0 = vld [vmem:[#allocation10 + $0x28] sm:$0xff]   ;;  %v3648_v13 = vld [vmem:[#allocation10 + $0x70] sm:$0xff]  }
 0x241   : > { %v4708_v27 = vpack.c.bf16 %v891_v19, %v890_v18  ;;  %3226 = vmatprep.subr.bf16.mxu0 %v3621_v10  ;;  %v4731_v38 = vsel %vm4632_vm5, %v1022_v26, 0  ;;  %v952_v44 = vor.u32 %v950_v3, %v949_v15  ;;  %v1001_v47 = vsel %vm4625_vm4, 0, %v4724_v36  ;;  %v3624_v3 = vld [vmem:[#allocation10 + $0xa8] sm:$0xff]   ;;  %v3661_v36 = vld [vmem:[#allocation10 + $0x210] sm:$0xff]  }
 0x242   : > { %v4711_v30 = vpack.c.bf16 %v889_v23, %v888_v22  ;;  %v4719_v31 = vsel %vm4632_vm5, %v1020_v24, 0  ;;  %2985 = vmatpush3.bf16.msra.mxu1 %v3638_v16  ;;  %v982_v17 = vshrl.u32 %v4726_v37, 16  ;;  %v985_v25 = vshll.u32 %v4726_v37, 16  ;;  %v3650_v24 = vld [vmem:[#allocation10 + $0x30] sm:$0xff]  }
 0x243   : > { %1344 = vmatmul.mubr.bf16.gmra.mrb[12].mxu1 %v4715_v28  ;;  %3211 = vmatmul.mubr.bf16.gmra.mrb[20].mxu0 %v4719_v31  ;;  %v971_v34 = vshll.u32 %v4708_v27, 16  ;;  %v968_v56 = vshrl.u32 %v4708_v27, 16  ;;  %v1027_v5 = vrot.slane %v978_v40, 1  ;;  %v956_v62 = vrot.slane %v954_v14, 7 }
 0x244   : > { %3227 = vmatpush3.bf16.msra.mxu0 %v3621_v10  ;;  %1351 = vmatprep.mubr.bf16.mxu1 %v4673_v48  ;;  %v964_v39 = vshll.u32 %v4711_v30, 16  ;;  %v961_v50 = vshrl.u32 %v4711_v30, 16  ;;  %v984_v57 = vrot.slane %v982_v17, 7  ;;  %v1029_v63 = vrot.slane %v985_v25, 1 }
 0x245   : > { %3214 = vmatprep.mubr.bf16.mxu0 %v4731_v38  ;;  %3228 = vmatprep.subr.bf16.mxu0 %v3622_v2  ;;  %v1025_v45 = vrot.slane %v971_v34, 1  ;;  %v4755_v10 = vsel %vm4625_vm4, 0, %v952_v44  ;;  %v975_v14 = vshrl.u32 %v4620_v49, 16  ;;  %v1011_v19 = vrot.slane %v922_v29, 1  ;;  %v3633_v44 = vld [vmem:[#allocation10 + $0x180] sm:$0xff]  }
 0x246   : > { %v1023_v54 = vrot.slane %v964_v39, 1  ;;  %2986 = vmatprep.subr.bf16.mxu1 %v3640_v32  ;;  %v4751_v6 = vor.u32 %v985_v25, %v984_v57  ;;  %v4761_v12 = vor.u32 %v1029_v63, %v982_v17  ;;  %v959_v22 = vor.u32 %v957_v58, %v956_v62  ;;  %v3652_v58 = vld [vmem:[#allocation10 + $0x78] sm:$0xff]   ;;  %v3641_v57 = vld [vmem:[#allocation10 + $0x190] sm:$0xff]  }
 0x247   : > { %2987 = vmatpush3.bf16.msra.mxu1 %v3642_v35  ;;  %v1026_v61 = vor.u32 %v1025_v45, %v968_v56  ;;  %v1028_v23 = vor.u32 %v1027_v5, %v975_v14  ;;  %v1012_v26 = vor.u32 %v1011_v19, %v919_v59  ;;  %v963_v32 = vrot.slane %v961_v50, 7  ;;  %v3654_v35 = vld [vmem:[#allocation10 + $0x38] sm:$0xff]   ;;  %v3635_v45 = vld [vmem:[#allocation10 + $0x1c8] sm:$0xff]   ;;  %v3659_v19 = vld [vmem:[#allocation10 + $0x200] sm:$0xff]  }
 0x248   : > { %3229 = vmatpush3.bf16.msra.mxu0 %v3622_v2  ;;  %v1024_v60 = vor.u32 %v1023_v54, %v961_v50  ;;  %2988 = vmatprep.subr.bf16.mxu1 %v3644_v42  ;;  %v1010_v16 = vsel %vm4625_vm4, 0, %v4751_v6  ;;  %v1053_v20 = vsel %vm4632_vm5, %v4761_v12, 0  ;;  %v3628_v2 = vld [vmem:[#allocation10 + $0xb8] sm:$0xff]   ;;  %v4784_v15 = vsel %vm4625_vm4, 0, %v959_v22  ;;  %v3631_v42 = vld [vmem:[#allocation10 + $0x1c0] sm:$0xff]   ;;  %v3639_v54 = vld [vmem:[#allocation10 + $0x1d0] sm:$0xff]  }
 0x249   : > { %3230 = vmatprep.subr.bf16.mxu0 %v3623_v43  ;;  %v4771_v18 = vsel %vm4632_vm5, %v1026_v61, 0  ;;  %v4788_v29 = vsel %vm4632_vm5, %v1028_v23, 0  ;;  %v1044_v59 = vsel %vm4632_vm5, %v1012_v26, 0  ;;  %v970_v50 = vrot.slane %v968_v56, 7  ;;  %v3645_v61 = vld [vmem:[#allocation10 + $0x198] sm:$0xff]   ;;  %v3651_v5 = vld [vmem:[#allocation10 + $0x1e8] sm:$0xff]  }
 0x24a   : > { %v4759_v11 = vsel %vm4632_vm5, %v1024_v60, 0  ;;  %v3643_v60 = vld [vmem:[#allocation10 + $0x1d8] sm:$0xff]  }
 0x24b   : > { %1352 = vmatmul.mubr.bf16.gmra.mrb[16].mxu1 %v4755_v10  ;;  %3215 = vmatmul.mubr.bf16.gmra.mrb[24].mxu0 %v4759_v11  ;;  %v973_v25 = vor.u32 %v971_v34, %v970_v50  ;;  %v3647_v34 = vld [vmem:[#allocation10 + $0x1e0] sm:$0xff]   ;;  %v3674_v26 = vld [vmem:[#allocation11 + $0x38] sm:$0xff]  }
 0x24c   : > { %3231 = vmatpush3.bf16.msra.mxu0 %v3623_v43  ;;  %1359 = vmatprep.mubr.bf16.mxu1 %v4669_v41  ;;  %v966_v43 = vor.u32 %v964_v39, %v963_v32  ;;  %v3637_v39 = vld [vmem:[#allocation10 + $0x188] sm:$0xff]  }
 0x24d   : > { %3218 = vmatprep.mubr.bf16.mxu0 %v4771_v18  ;;  %3232 = vmatprep.subr.bf16.mxu0 %v3624_v3  ;;  %v4811_v56 = vsel %vm4625_vm4, 0, %v973_v25 }
 0x24e   : > { %2989 = vmatpush3.bf16.msra.mxu1 %v3646_v0  ;;  %v4799_v17 = vsel %vm4625_vm4, 0, %v966_v43  ;;  %v3653_v0 = vld [vmem:[#allocation10 + $0x1a8] sm:$0xff]  }
 0x24f   : > { %2990 = vmatprep.subr.bf16.mxu1 %v3648_v13  ;;  %v3656_v13 = vld [vmem:[#allocation10 + $0x1b0] sm:$0xff]  }
 0x250   : > { %3233 = vmatpush3.bf16.msra.mxu0 %v3624_v3  ;;  %v3649_v3 = vld [vmem:[#allocation10 + $0x1a0] sm:$0xff]  }
 0x251   : > { %3234 = vmatprep.subr.bf16.mxu0 %v3625_v21 }
 0x252   : > { %2991 = vmatpush3.bf16.msra.mxu1 %v3650_v24 }
 0x253   : > { %1360 = vmatmul.mubr.bf16.gmra.mrb[20].mxu1 %v4784_v15  ;;  %3219 = vmatmul.mubr.bf16.gmra.mrb[28].mxu0 %v4788_v29 }
 0x254   : > { %3235 = vmatpush3.bf16.msra.mxu0 %v3625_v21  ;;  %1367 = vmatprep.mubr.bf16.mxu1 %v4711_v30  ;;  %v3660_v21 = vld [vmem:[#allocation10 + $0x208] sm:$0xff]  }
 0x255   : > { %3238 = vmatprep.mubr.bf16.mxu0 %v1044_v59  ;;  %3236 = vmatprep.subr.bf16.mxu0 %v3628_v2 }
 0x256   : > { %2992 = vmatprep.subr.bf16.mxu1 %v3652_v58 }
 0x257   : > { %2993 = vmatpush3.bf16.msra.mxu1 %v3654_v35 }
 0x258   : > { %3237 = vmatpush3.bf16.msra.mxu0 %v3628_v2 }
 0x259   : > { %3058 = vmatprep.subr.bf16.mxu0 %v3631_v42 }
 0x25b   : > { %1368 = vmatmul.mubr.bf16.gmra.mrb[24].mxu1 %v4799_v17  ;;  %3239 = vmatmul.mubr.bf16.vlgmr.msra.gmra.mrb[16].mxu0 %v4649_v8  ;;  %v977_v8 = vrot.slane %v975_v14, 7  ;;  %v3657_v14 = vld [vmem:[#allocation10 + $0x1f8] sm:$0xff]  }
 0x25c   : > { %3059 = vmatpush3.bf16.msra.mxu0 %v3633_v44  ;;  %1375 = vmatprep.mubr.bf16.mxu1 %v4708_v27 }
 0x25d   : > { %3242 = vmatprep.mubr.bf16.mxu0 %v4682_v53  ;;  %3060 = vmatprep.subr.bf16.mxu0 %v3635_v45  ;;  %v980_v63 = vor.u32 %v978_v40, %v977_v8  ;;  %v3655_v40 = vld [vmem:[#allocation10 + $0x1f0] sm:$0xff]  }
 0x25f   : > { %v4821_v62 = vsel %vm4625_vm4, 0, %v980_v63 }
 0x260   : > { %3061 = vmatpush3.bf16.msra.mxu0 %v3637_v39 }
 0x261   : > { %3062 = vmatprep.subr.bf16.mxu0 %v3639_v54 }
 0x263   : > { %1376 = vmatmul.mubr.bf16.gmra.mrb[28].mxu1 %v4811_v56  ;;  %3243 = vmatmul.mubr.bf16.gmra.mrb[20].mxu0 %v4696_v1 }
 0x264   : > { %3063 = vmatpush3.bf16.msra.mxu0 %v3641_v57  ;;  %1383 = vmatprep.mubr.bf16.mxu1 %v4620_v49 }
 0x265   : > { %3246 = vmatprep.mubr.bf16.mxu0 %v4719_v31  ;;  %3064 = vmatprep.subr.bf16.mxu0 %v3643_v60 }
 0x268   : > { %3065 = vmatpush3.bf16.msra.mxu0 %v3645_v61 }
 0x269   : > { %3066 = vmatprep.subr.bf16.mxu0 %v3647_v34 }
 0x26b   : > { %1384 = vmatmul.mubr.bf16.gmra.mrb[32].mxu1 %v4821_v62  ;;  %3247 = vmatmul.mubr.bf16.gmra.mrb[24].mxu0 %v4731_v38 }
 0x26c   : > { %3067 = vmatpush3.bf16.msra.mxu0 %v3649_v3  ;;  %1665 = vmatprep.mubr.bf16.mxu1 %v4616_v46  ;;  %v3658_v46 = vld [vmem:[#allocation10 + $0x1b8] sm:$0xff]  }
 0x26d   : > { %3250 = vmatprep.mubr.bf16.mxu0 %v4759_v11  ;;  %3068 = vmatprep.subr.bf16.mxu0 %v3651_v5 }
 0x270   : > { %3069 = vmatpush3.bf16.msra.mxu0 %v3653_v0 }
 0x271   : > { %3070 = vmatprep.subr.bf16.mxu0 %v3655_v40 }
 0x273   : > { %1666 = vmatmul.mubr.bf16.vlgmr.msra.gmra.mrb[36].mxu1 %v1001_v47  ;;  %3251 = vmatmul.mubr.bf16.gmra.mrb[28].mxu0 %v4771_v18 }
 0x274   : > { %3071 = vmatpush3.bf16.msra.mxu0 %v3656_v13  ;;  %1673 = vmatprep.mubr.bf16.mxu1 %v4606_v33  ;;  %v3662_v33 = vld [vmem:[#allocation10 + $0x218] sm:$0xff]  }
 0x275   : > { %2052 = vmatprep.mubr.bf16.mxu0 %v4651_v9  ;;  %3072 = vmatprep.subr.bf16.mxu0 %v3657_v14 }
 0x278   : > { %3073 = vmatpush3.bf16.msra.mxu0 %v3658_v46 }
 0x279   : > { %3254 = vmatprep.subr.bf16.mxu0 %v3659_v19 }
 0x27b   : > { %1674 = vmatmul.mubr.bf16.gmra.mrb[40].mxu1 %v4645_v7  ;;  %2053 = vmatmul.mubr.bf16.vlgmr.msra.gmra.mrb[32].mxu0 %v4678_v51  ;;  %v3663_v7 = vld [vmem:[#allocation10 + $0x220] sm:$0xff]  }
 0x27c   : > { %3255 = vmatpush3.bf16.msra.mxu0 %v3659_v19  ;;  %1681 = vmatprep.mubr.bf16.mxu1 %v4651_v9  ;;  %v3664_v9 = vld [vmem:[#allocation10 + $0x228] sm:$0xff]  }
 0x27d   : > { %2060 = vmatprep.mubr.bf16.mxu0 %v4640_v4  ;;  %3256 = vmatprep.subr.bf16.mxu0 %v3660_v21 }
 0x280   : > { %3257 = vmatpush3.bf16.msra.mxu0 %v3660_v21 }
 0x281   : > { %3258 = vmatprep.subr.bf16.mxu0 %v3661_v36 }
 0x283   : > { %1682 = vmatmul.mubr.bf16.gmra.mrb[44].mxu1 %v4678_v51  ;;  %2061 = vmatmul.mubr.bf16.gmra.mrb[36].mxu0 %v4715_v28  ;;  %v3665_v51 = vld [vmem:[#allocation10 + $0x230] sm:$0xff]  }
 0x284   : > { %1689 = vmatprep.mubr.bf16.mxu1 %v4640_v4  ;;  %2068 = vmatprep.mubr.bf16.mxu0 %v4673_v48  ;;  %v3666_v4 = vld [vmem:[#allocation10 + $0x238] sm:$0xff]  }
 0x285   : > { %3259 = vmatpush3.bf16.msra.mxu0 %v3661_v36 }
 0x286   : > { %3260 = vmatprep.subr.bf16.mxu0 %v3662_v33 }
 0x289   : > { %3261 = vmatpush3.bf16.msra.mxu0 %v3662_v33 }
 0x28a   : > { %3262 = vmatprep.subr.bf16.mxu0 %v3663_v7 }
 0x28b   : > { %1690 = vmatmul.mubr.bf16.gmra.mrb[48].mxu1 %v4715_v28  ;;  %2069 = vmatmul.mubr.bf16.gmra.mrb[40].mxu0 %v4755_v10 }
 0x28c   : > { %1697 = vmatprep.mubr.bf16.mxu1 %v4673_v48  ;;  %2076 = vmatprep.mubr.bf16.mxu0 %v4669_v41  ;;  %v3670_v48 = vld [vmem:[#allocation11 + $0x18] sm:$0xff]  }
 0x28d   : > { %3263 = vmatpush3.bf16.msra.mxu0 %v3663_v7 }
 0x28e   : > { %3264 = vmatprep.subr.bf16.mxu0 %v3664_v9 }
 0x291   : > { %3265 = vmatpush3.bf16.msra.mxu0 %v3664_v9 }
 0x292   : > { %3266 = vmatprep.subr.bf16.mxu0 %v3665_v51 }
 0x293   : > { %1698 = vmatmul.mubr.bf16.gmra.mrb[52].mxu1 %v4755_v10  ;;  %2077 = vmatmul.mubr.bf16.gmra.mrb[44].mxu0 %v4784_v15 }
 0x294   : > { %1705 = vmatprep.mubr.bf16.mxu1 %v4669_v41  ;;  %2084 = vmatprep.mubr.bf16.mxu0 %v4711_v30  ;;  %v3669_v41 = vld [vmem:[#allocation11 + $0x10] sm:$0xff]  }
 0x295   : > { %3267 = vmatpush3.bf16.msra.mxu0 %v3665_v51 }
 0x296   : > { %3268 = vmatprep.subr.bf16.mxu0 %v3666_v4 }
 0x299   : > { %3269 = vmatpush3.bf16.msra.mxu0 %v3666_v4 }
 0x29b   : > { %1706 = vmatmul.mubr.bf16.gmra.mrb[56].mxu1 %v4784_v15  ;;  %2085 = vmatmul.mubr.bf16.gmra.mrb[48].mxu0 %v4799_v17 }
 0x29c   : > { %1713 = vmatprep.mubr.bf16.mxu1 %v4711_v30  ;;  %2092 = vmatprep.mubr.bf16.mxu0 %v4708_v27 }
 0x2a3   : > { %1714 = vmatmul.mubr.bf16.gmra.mrb[60].mxu1 %v4799_v17  ;;  %2093 = vmatmul.mubr.bf16.gmra.mrb[52].mxu0 %v4811_v56 }
 0x2a4   : > { %1721 = vmatprep.mubr.bf16.mxu1 %v4708_v27  ;;  %2100 = vmatprep.mubr.bf16.mxu0 %v4620_v49  ;;  %v3667_v49 = vld [vmem:[#allocation11] sm:$0xff]  }
 0x2a5   : > { %3286 = vmatprep.subr.bf16.mxu1 %v3667_v49 }
 0x2a6   : > { %3287 = vmatpush3.bf16.msra.mxu1 %v3667_v49 }
 0x2a7   : > { %3288 = vmatprep.subr.bf16.mxu1 %v3668_v52 }
 0x2aa   : > { %3289 = vmatpush3.bf16.msra.mxu1 %v3668_v52 }
 0x2ab   : > { %1722 = vmatmul.mubr.bf16.gmra.mrb[64].mxu1 %v4811_v56  ;;  %2101 = vmatmul.mubr.bf16.gmra.mrb[56].mxu0 %v4821_v62 }
 0x2ac   : > { %2108 = vmatprep.mubr.bf16.mxu0 %v4726_v37  ;;  %3290 = vmatprep.subr.bf16.mxu1 %v3669_v41 }
 0x2ae   : > { %3291 = vmatpush3.bf16.msra.mxu1 %v3669_v41 }
 0x2af   : > { %3292 = vmatprep.subr.bf16.mxu1 %v3670_v48 }
 0x2b2   : > { %3293 = vmatpush3.bf16.msra.mxu1 %v3670_v48 }
 0x2b3   : > { %2109 = vmatmul.mubr.bf16.gmra.mrb[60].mxu0 %v1010_v16 }
 0x2b4   : > { %3270 = vmatprep.mubr.bf16.mxu0 %v4682_v53  ;;  %v3671_v53 = vld [vmem:[#allocation11 + $0x20] sm:$0xff]  }
 0x2b5   : > { %3294 = vmatprep.subr.bf16.mxu1 %v3671_v53 }
 0x2b6   : > { %3295 = vmatpush3.bf16.msra.mxu1 %v3671_v53 }
 0x2bb   : > { %3271 = vmatmul.mubr.bf16.vlgmr.msra.gmra.mrb[16].mxu0 %v4696_v1  ;;  %v3672_v1 = vld [vmem:[#allocation11 + $0x28] sm:$0xff]  }
 0x2bc   : > { %3274 = vmatprep.mubr.bf16.mxu0 %v4719_v31  ;;  %3296 = vmatprep.subr.bf16.mxu1 %v3672_v1 }
 0x2bd   : > { %3297 = vmatpush3.bf16.msra.mxu1 %v3672_v1 }
 0x2c3   : > { %3275 = vmatmul.mubr.bf16.gmra.mrb[20].mxu0 %v4731_v38  ;;  %v3673_v38 = vld [vmem:[#allocation11 + $0x30] sm:$0xff]  }
 0x2c4   : > { %3278 = vmatprep.mubr.bf16.mxu0 %v4759_v11  ;;  %3298 = vmatprep.subr.bf16.mxu1 %v3673_v38 }
 0x2c5   : > { %3299 = vmatpush3.bf16.msra.mxu1 %v3673_v38 }
 0x2c6   : > { %3300 = vmatprep.subr.bf16.mxu1 %v3674_v26 }
 0x2c9   : > { %3301 = vmatpush3.bf16.msra.mxu1 %v3674_v26 }
 0x2cb   : > { %3279 = vmatmul.mubr.bf16.gmra.mrb[24].mxu0 %v4771_v18 }
 0x2cc   : > { %3282 = vmatprep.mubr.bf16.mxu0 %v4788_v29 }
 0x2d3   : > { %3283 = vmatmul.mubr.bf16.gmra.mrb[28].mxu0 %v1053_v20 }
 0x305   : > { %v2914_v55 = vpop.f32.mrb[4].mxu1 }
 0x306   : > { %v2915_v27 = vpop.f32.mrb[5].mxu1 }
 0x307   : > { %v2916_v30 = vadd.f32 %v2915_v27, %v2914_v55  ;;  %v2917_v28 = vpop.f32.mrb[6].mxu1 }
 0x308   : > { %v2918_v31 = vpop.f32.mrb[7].mxu1 }
 0x309   : > { %v2919_v37 = vadd.f32 %v2918_v31, %v2917_v28 }
 0x30e   : > { %v2920_v47 = vpop.f32.mrb[8].mxu1 }
 0x30f   : > { %v2921_v6 = vpop.f32.mrb[9].mxu1 }
 0x310   : > { %v2922_v10 = vadd.f32 %v2921_v6, %v2920_v47  ;;  %v2923_v11 = vpop.f32.mrb[10].mxu1 }
 0x311   : > { %v2924_v12 = vpop.f32.mrb[11].mxu1 }
 0x312   : > { %v2925_v16 = vadd.f32 %v2924_v12, %v2923_v11 }
 0x316   : > { %v2926_v18 = vpop.f32.mrb[12].mxu1 }
 0x317   : > { %v2927_v20 = vpop.f32.mrb[13].mxu1 }
 0x318   : > { %v4876_v22 = vadd.f32 %v2927_v20, %v2926_v18  ;;  %v2929_v23 = vpop.f32.mrb[14].mxu1 }
 0x319   : > { %v2930_v24 = vpop.f32.mrb[15].mxu1 }
 0x31a   : > { %v4878_v2 = vadd.f32 %v2930_v24, %v2929_v23 }
 0x31e   : > { %v2932_v15 = vpop.f32.mrb[16].mxu1 }
 0x31f   : > { %v2933_v29 = vpop.f32.mrb[17].mxu1 }
 0x320   : > { %v4880_v32 = vadd.f32 %v2933_v29, %v2932_v15  ;;  %v2935_v58 = vpop.f32.mrb[18].mxu1 }
 0x321   : > { %v2936_v35 = vpop.f32.mrb[19].mxu1 }
 0x322   : > { %v4882_v59 = vadd.f32 %v2936_v35, %v2935_v58 }
 0x326   : > { %v2938_v42 = vpop.f32.mrb[20].mxu1 }
 0x327   : > { %v2939_v43 = vpop.f32.mrb[21].mxu1 }
 0x328   : > { %v4884_v44 = vadd.f32 %v2939_v43, %v2938_v42  ;;  %v2941_v45 = vpop.f32.mrb[22].mxu1 }
 0x329   : > { %v2942_v17 = vpop.f32.mrb[23].mxu1 }
 0x32a   : > { %v4886_v50 = vadd.f32 %v2942_v17, %v2941_v45 }
 0x32e   : > { %v2944_v39 = vpop.f32.mrb[24].mxu1 }
 0x32f   : > { %v2945_v54 = vpop.f32.mrb[25].mxu1 }
 0x330   : > { %v4888_v25 = vadd.f32 %v2945_v54, %v2944_v39  ;;  %v2947_v57 = vpop.f32.mrb[26].mxu1 }
 0x331   : > { %v2948_v60 = vpop.f32.mrb[27].mxu1 }
 0x332   : > { %v4890_v56 = vadd.f32 %v2948_v60, %v2947_v57 }
 0x336   : > { %v2950_v8 = vpop.f32.mrb[28].mxu1 }
 0x337   : > { %v2951_v61 = vpop.f32.mrb[29].mxu1 }
 0x338   : > { %v4892_v34 = vadd.f32 %v2951_v61, %v2950_v8  ;;  %v2953_v63 = vpop.f32.mrb[30].mxu1 }
 0x339   : > { %v2954_v3 = vpop.f32.mrb[31].mxu1 }
 0x33a   : > { %v4894_v5 = vadd.f32 %v2954_v3, %v2953_v63 }
 0x33e   : > { %v2956_v62 = vpop.f32.mrb[32].mxu1 }
 0x33f   : > { %v2957_v0 = vpop.f32.mrb[33].mxu1 }
 0x340   : > { %v4896_v40 = vadd.f32 %v2957_v0, %v2956_v62  ;;  %v2959_v13 = vpop.f32.mrb[34].mxu1 }
 0x341   : > { %v2960_v14 = vpop.f32.mrb[35].mxu1 }
 0x342   : > { %v4898_v46 = vadd.f32 %v2960_v14, %v2959_v13 }
 0x346   : > { %v2994_v19 = vpop.f32.mrb[36].mxu1 }
 0x347   : > { %v2995_v21 = vpop.f32.mrb[37].mxu1 }
 0x348   : > { %v2996_v36 = vadd.f32 %v2995_v21, %v2994_v19  ;;  %v2997_v33 = vpop.f32.mrb[38].mxu1 }
 0x349   : > { %v2998_v7 = vpop.f32.mrb[39].mxu1 }
 0x34a   : > { %v3337_v9 = vadd.f32 %v2996_v36, %v2916_v30  ;;  %v2999_v51 = vadd.f32 %v2998_v7, %v2997_v33 }
 0x34c   : > { %v3343_v4 = vadd.f32 %v2999_v51, %v2919_v37 }
 0x34e   : > { %v3000_v49 = vpop.f32.mrb[40].mxu1  ;;  %v3074_v52 = vpop.f32.mrb[32].mxu0 }
 0x34f   : > { %v3001_v41 = vpop.f32.mrb[41].mxu1  ;;  %v3075_v48 = vpop.f32.mrb[33].mxu0 }
 0x350   : > { %v3002_v53 = vadd.f32 %v3001_v41, %v3000_v49  ;;  %v3076_v1 = vadd.f32 %v3075_v48, %v3074_v52  ;;  %v3003_v55 = vpop.f32.mrb[42].mxu1  ;;  %v3077_v27 = vpop.f32.mrb[34].mxu0 }
 0x351   : > { %v3004_v28 = vpop.f32.mrb[43].mxu1  ;;  %v3078_v31 = vpop.f32.mrb[35].mxu0 }
 0x352   : > { %v3334_v38 = vadd.f32 %v3002_v53, %v2922_v10  ;;  %v3005_v47 = vadd.f32 %v3004_v28, %v3003_v55  ;;  %v3079_v6 = vadd.f32 %v3078_v31, %v3077_v27  ;;  %v4900_v11 = vadd.f32 %v3337_v9, %v3076_v1 }
 0x354   : > { %v3340_v12 = vadd.f32 %v3005_v47, %v2925_v16  ;;  %v4902_v18 = vadd.f32 %v3343_v4, %v3079_v6 }
 0x356   : > { %v3006_v30 = vpop.f32.mrb[44].mxu1  ;;  %v3080_v37 = vpop.f32.mrb[36].mxu0 }
 0x357   : > { %v3007_v20 = vpop.f32.mrb[45].mxu1  ;;  %v3081_v23 = vpop.f32.mrb[37].mxu0 }
 0x358   : > { %v3008_v24 = vadd.f32 %v3007_v20, %v3006_v30  ;;  %v3082_v26 = vadd.f32 %v3081_v23, %v3080_v37  ;;  %v3009_v15 = vpop.f32.mrb[46].mxu1  ;;  %v3083_v29 = vpop.f32.mrb[38].mxu0 }
 0x359   : > { %v3010_v58 = vpop.f32.mrb[47].mxu1  ;;  %v3084_v35 = vpop.f32.mrb[39].mxu0 }
 0x35a   : > { %v3349_v42 = vadd.f32 %v3008_v24, %v4876_v22  ;;  %v3011_v10 = vadd.f32 %v3010_v58, %v3009_v15  ;;  %v3085_v43 = vadd.f32 %v3084_v35, %v3083_v29  ;;  %v4905_v45 = vadd.f32 %v3334_v38, %v3082_v26 }
 0x35c   : > { %v3355_v16 = vadd.f32 %v3011_v10, %v4878_v2  ;;  %v4908_v17 = vadd.f32 %v3340_v12, %v3085_v43 }
 0x35e   : > { %v3012_v39 = vpop.f32.mrb[48].mxu1  ;;  %v3086_v54 = vpop.f32.mrb[40].mxu0 }
 0x35f   : > { %v3013_v57 = vpop.f32.mrb[49].mxu1  ;;  %v3087_v60 = vpop.f32.mrb[41].mxu0 }
 0x360   : > { %v3014_v8 = vadd.f32 %v3013_v57, %v3012_v39  ;;  %v3088_v61 = vadd.f32 %v3087_v60, %v3086_v54  ;;  %v3015_v63 = vpop.f32.mrb[50].mxu1  ;;  %v3089_v3 = vpop.f32.mrb[42].mxu0 }
 0x361   : > { %v3016_v62 = vpop.f32.mrb[51].mxu1  ;;  %v3090_v0 = vpop.f32.mrb[43].mxu0 }
 0x362   : > { %v3346_v22 = vadd.f32 %v3014_v8, %v4880_v32  ;;  %v3017_v13 = vadd.f32 %v3016_v62, %v3015_v63  ;;  %v3091_v14 = vadd.f32 %v3090_v0, %v3089_v3  ;;  %v4911_v19 = vadd.f32 %v3349_v42, %v3088_v61 }
 0x364   : > { %v3352_v2 = vadd.f32 %v3017_v13, %v4882_v59  ;;  %v4914_v21 = vadd.f32 %v3355_v16, %v3091_v14 }
 0x366   : > { %v3018_v36 = vpop.f32.mrb[52].mxu1  ;;  %v3092_v33 = vpop.f32.mrb[44].mxu0 }
 0x367   : > { %v3019_v7 = vpop.f32.mrb[53].mxu1  ;;  %v3093_v9 = vpop.f32.mrb[45].mxu0 }
 0x368   : > { %v3020_v51 = vadd.f32 %v3019_v7, %v3018_v36  ;;  %v3094_v4 = vadd.f32 %v3093_v9, %v3092_v33  ;;  %v3021_v49 = vpop.f32.mrb[54].mxu1  ;;  %v3095_v52 = vpop.f32.mrb[46].mxu0 }
 0x369   : > { %v3022_v41 = vpop.f32.mrb[55].mxu1  ;;  %v3096_v48 = vpop.f32.mrb[47].mxu0 }
 0x36a   : > { %v3361_v32 = vadd.f32 %v3020_v51, %v4884_v44  ;;  %v3023_v53 = vadd.f32 %v3022_v41, %v3021_v49  ;;  %v3097_v1 = vadd.f32 %v3096_v48, %v3095_v52  ;;  %v4917_v55 = vadd.f32 %v3346_v22, %v3094_v4 }
 0x36c   : > { %v3367_v59 = vadd.f32 %v3023_v53, %v4886_v50  ;;  %v4920_v27 = vadd.f32 %v3352_v2, %v3097_v1 }
 0x36e   : > { %v3024_v28 = vpop.f32.mrb[56].mxu1  ;;  %v3098_v31 = vpop.f32.mrb[48].mxu0 }
 0x36f   : > { %v3025_v38 = vpop.f32.mrb[57].mxu1  ;;  %v3099_v47 = vpop.f32.mrb[49].mxu0 }
 0x370   : > { %v3026_v6 = vadd.f32 %v3025_v38, %v3024_v28  ;;  %v3100_v12 = vadd.f32 %v3099_v47, %v3098_v31  ;;  %v3027_v30 = vpop.f32.mrb[58].mxu1  ;;  %v3101_v37 = vpop.f32.mrb[50].mxu0 }
 0x371   : > { %v3028_v20 = vpop.f32.mrb[59].mxu1  ;;  %v3102_v23 = vpop.f32.mrb[51].mxu0 }
 0x372   : > { %v3358_v44 = vadd.f32 %v3026_v6, %v4888_v25  ;;  %v3029_v24 = vadd.f32 %v3028_v20, %v3027_v30  ;;  %v3103_v26 = vadd.f32 %v3102_v23, %v3101_v37  ;;  %v4923_v15 = vadd.f32 %v3361_v32, %v3100_v12  ;;  %v4953_v6 = vld [vmem:[%s5303_s1] ss:$0 sm:$0xff] }
 0x374   : > { %v3364_v50 = vadd.f32 %v3029_v24, %v4890_v56  ;;  %v4926_v29 = vadd.f32 %v3367_v59, %v3103_v26 }
 0x376   : > { %v3030_v58 = vpop.f32.mrb[60].mxu1  ;;  %v3104_v35 = vpop.f32.mrb[52].mxu0 }
 0x377   : > { %v3031_v42 = vpop.f32.mrb[61].mxu1  ;;  %v3105_v10 = vpop.f32.mrb[53].mxu0 }
 0x378   : > { %v3032_v43 = vadd.f32 %v3031_v42, %v3030_v58  ;;  %v3106_v16 = vadd.f32 %v3105_v10, %v3104_v35  ;;  %v3033_v39 = vpop.f32.mrb[62].mxu1  ;;  %v3107_v54 = vpop.f32.mrb[54].mxu0 }
 0x379   : > { %v3034_v57 = vpop.f32.mrb[63].mxu1  ;;  %v3108_v60 = vpop.f32.mrb[55].mxu0 }
 0x37a   : > { %v3373_v25 = vadd.f32 %v3032_v43, %v4892_v34  ;;  %v3035_v8 = vadd.f32 %v3034_v57, %v3033_v39  ;;  %v3109_v61 = vadd.f32 %v3108_v60, %v3107_v54  ;;  %v4929_v63 = vadd.f32 %v3358_v44, %v3106_v16 }
 0x37c   : > { %v3379_v56 = vadd.f32 %v3035_v8, %v4894_v5  ;;  %v4932_v3 = vadd.f32 %v3364_v50, %v3109_v61 }
 0x37e   : > { %v3036_v62 = vpop.f32.mrb[64].mxu1  ;;  %v3110_v0 = vpop.f32.mrb[56].mxu0 }
 0x37f   : > { %v3037_v22 = vpop.f32.mrb[65].mxu1  ;;  %v3111_v13 = vpop.f32.mrb[57].mxu0 }
 0x380   : > { %v3038_v14 = vadd.f32 %v3037_v22, %v3036_v62  ;;  %v3112_v2 = vadd.f32 %v3111_v13, %v3110_v0  ;;  %v3039_v36 = vpop.f32.mrb[66].mxu1  ;;  %v3113_v33 = vpop.f32.mrb[58].mxu0 }
 0x381   : > { %v3040_v7 = vpop.f32.mrb[67].mxu1  ;;  %v3114_v9 = vpop.f32.mrb[59].mxu0 }
 0x382   : > { %v3370_v34 = vadd.f32 %v3038_v14, %v4896_v40  ;;  %v3041_v51 = vadd.f32 %v3040_v7, %v3039_v36  ;;  %v3115_v4 = vadd.f32 %v3114_v9, %v3113_v33  ;;  %v4935_v49 = vadd.f32 %v3373_v25, %v3112_v2  ;;  %v4947_v40 = vld [vmem:[%s5302_s14] ss:$0 sm:$0xff]  ;;  %s5086_s14 = scalar_lea.hbm %s5307_s6, %s2875_s30 }
 0x384   : > { %v3376_v5 = vadd.f32 %v3041_v51, %v4898_v46  ;;  %v4938_v52 = vadd.f32 %v3379_v56, %v3115_v4 }
 0x386   : > { %v3116_v41 = vpop.f32.mrb[60].mxu0 }
 0x387   : > { %v3117_v48 = vpop.f32.mrb[61].mxu0 }
 0x388   : > { %v3118_v32 = vadd.f32 %v3117_v48, %v3116_v41  ;;  %v3119_v53 = vpop.f32.mrb[62].mxu0 }
 0x389   : > { %v3120_v1 = vpop.f32.mrb[63].mxu0 }
 0x38a   : > { %v3121_v59 = vadd.f32 %v3120_v1, %v3119_v53  ;;  %v4940_v28 = vadd.f32 %v3370_v34, %v3118_v32 }
 0x38c   : > { %v4942_v31 = vadd.f32 %v3376_v5, %v3121_v59 }
 0x38e   : > { %v3272_v38 = vpop.f32.mrb[16].mxu0 }
 0x38f   : > { %v3336_v46 = vadd.f32 %v4905_v45, %v3272_v38  ;;  %v2151_v47 = vpop.f32.mrb[17].mxu0 }
 0x390   : > { %v3339_v12 = vadd.f32 %v4900_v11, %v2151_v47  ;;  %v3273_v30 = vpop.f32.mrb[18].mxu0 }
 0x391   : > { %v2239_v37 = vmul.f32 %v3336_v46, %v4947_v40  ;;  %v3342_v20 = vadd.f32 %v4908_v17, %v3273_v30  ;;  %v2154_v23 = vpop.f32.mrb[19].mxu0 }
 0x392   : > { %v2237_v44 = vmul.f32 %v3339_v12, %v4947_v40  ;;  %v3345_v24 = vadd.f32 %v4902_v18, %v2154_v23 }
 0x393   : > { %v2262_v45 = vadd.f32 %v4953_v6, %v2239_v37  ;;  %v2240_v26 = vmul.f32 %v3342_v20, %v4947_v40 }
 0x394   : > { %v2260_v50 = vadd.f32 %v4953_v6, %v2237_v44  ;;  %v2238_v58 = vmul.f32 %v3345_v24, %v4947_v40 }
 0x395   : > { %v2263_v11 = vadd.f32 %v4953_v6, %v2240_v26  ;;  %v2278_v10 = vmax.f32 %v2262_v45, 0.0 }
 0x396   : > { %v2261_v35 = vadd.f32 %v4953_v6, %v2238_v58  ;;  %v3276_v42 = vpop.f32.mrb[20].mxu0  ;;  %v2276_v39 = vmax.f32 %v2260_v50, 0.0 }
 0x397   : > { %v2279_v17 = vmax.f32 %v2263_v11, 0.0  ;;  %v3348_v43 = vadd.f32 %v4917_v55, %v3276_v42  ;;  %v2167_v16 = vpop.f32.mrb[21].mxu0 }
 0x398   : > { %v2277_v18 = vmax.f32 %v2261_v35, 0.0  ;;  %v3351_v54 = vadd.f32 %v4911_v19, %v2167_v16  ;;  %v3277_v57 = vpop.f32.mrb[22].mxu0 }
 0x399   : > { %v2293_v60 = vpack.c.bf16 %v2279_v17, %v2278_v10  ;;  %v2243_v25 = vmul.f32 %v3348_v43, %v4947_v40  ;;  %v3354_v8 = vadd.f32 %v4920_v27, %v3277_v57  ;;  %v2170_v61 = vpop.f32.mrb[23].mxu0 }
 0x39a   : > { %v2241_v56 = vmul.f32 %v3351_v54, %v4947_v40  ;;  %v3357_v62 = vadd.f32 %v4914_v21, %v2170_v61  ;;  %v2292_v0 = vpack.c.bf16 %v2277_v18, %v2276_v39 }
 0x39b   : > { %v2266_v22 = vadd.f32 %v4953_v6, %v2243_v25  ;;  %v2244_v55 = vmul.f32 %v3354_v8, %v4947_v40 }
 0x39c   : > { %v2264_v13 = vadd.f32 %v4953_v6, %v2241_v56  ;;  %v2242_v19 = vmul.f32 %v3357_v62, %v4947_v40  ;;  %3302 = vmatprep.mubr.bf16.mxu1 %v2292_v0 }
 0x39d   : > { %v2267_v14 = vadd.f32 %v4953_v6, %v2244_v55  ;;  %3303 = vmatmul.mubr.bf16.vlgmr.msra.gmra.mrb[68].mxu1 %v2293_v60  ;;  %v2282_v36 = vmax.f32 %v2266_v22, 0.0 }
 0x39e   : > { %v2265_v27 = vadd.f32 %v4953_v6, %v2242_v19  ;;  %v3280_v2 = vpop.f32.mrb[24].mxu0  ;;  %v2280_v9 = vmax.f32 %v2264_v13, 0.0 }
 0x39f   : > { %v2283_v33 = vmax.f32 %v2267_v14, 0.0  ;;  %v3360_v21 = vadd.f32 %v4929_v63, %v3280_v2  ;;  %v2183_v7 = vpop.f32.mrb[25].mxu0  ;;  %v3675_v14 = vld [vmem:[%s4524_s4 + $0x10] sm:$0xff] }
 0x3a0   : > { %v2281_v34 = vmax.f32 %v2265_v27, 0.0  ;;  %v3363_v51 = vadd.f32 %v4923_v15, %v2183_v7  ;;  %v3281_v4 = vpop.f32.mrb[26].mxu0 }
 0x3a1   : > { %v2247_v5 = vmul.f32 %v3360_v21, %v4947_v40  ;;  %v3366_v41 = vadd.f32 %v4932_v3, %v3281_v4  ;;  %v2186_v48 = vpop.f32.mrb[27].mxu0  ;;  %v2295_v32 = vpack.c.bf16 %v2283_v33, %v2282_v36  ;;  %v3676_v36 = vld [vmem:[%s4524_s4] sm:$0xff]  ;;  %v3678_v4 = vld [vmem:[%s4524_s4 + $0x8] sm:$0xff] }
 0x3a2   : > { %v2245_v53 = vmul.f32 %v3363_v51, %v4947_v40  ;;  %v3369_v1 = vadd.f32 %v4926_v29, %v2186_v48  ;;  %v2294_v59 = vpack.c.bf16 %v2281_v34, %v2280_v9  ;;  %v3677_v9 = vld [vmem:[%s4524_s4 + $0x18] sm:$0xff] }
 0x3a3   : > { %v2270_v38 = vadd.f32 %v4953_v6, %v2247_v5  ;;  %v2248_v63 = vmul.f32 %v3366_v41, %v4947_v40 }
 0x3a4   : > { %v2268_v46 = vadd.f32 %v4953_v6, %v2245_v53  ;;  %v2246_v15 = vmul.f32 %v3369_v1, %v4947_v40  ;;  %3306 = vmatprep.mubr.bf16.mxu1 %v2294_v59 }
 0x3a5   : > { %v2271_v47 = vadd.f32 %v4953_v6, %v2248_v63  ;;  %3307 = vmatmul.mubr.bf16.gmra.mrb[72].mxu1 %v2295_v32  ;;  %v2286_v30 = vmax.f32 %v2270_v38, 0.0 }
 0x3a6   : > { %v2269_v3 = vadd.f32 %v4953_v6, %v2246_v15  ;;  %v3284_v12 = vpop.f32.mrb[28].mxu0  ;;  %v2284_v23 = vmax.f32 %v2268_v46, 0.0 }
 0x3a7   : > { %v2287_v37 = vmax.f32 %v2271_v47, 0.0  ;;  %v3372_v29 = vadd.f32 %v4940_v28, %v3284_v12  ;;  %v2199_v20 = vpop.f32.mrb[29].mxu0  ;;  %v3679_v12 = vld [vmem:[%s4524_s4 + $0x30] sm:$0xff] }
 0x3a8   : > { %v2285_v44 = vmax.f32 %v2269_v3, 0.0  ;;  %v3375_v24 = vadd.f32 %v4935_v49, %v2199_v20  ;;  %v3285_v45 = vpop.f32.mrb[30].mxu0 }
 0x3a9   : > { %v2251_v26 = vmul.f32 %v3372_v29, %v4947_v40  ;;  %v3378_v50 = vadd.f32 %v4942_v31, %v3285_v45  ;;  %v2202_v58 = vpop.f32.mrb[31].mxu0  ;;  %v2297_v11 = vpack.c.bf16 %v2287_v37, %v2286_v30  ;;  %v3680_v29 = vld [vmem:[%s4524_s4 + $0x20] sm:$0xff] }
 0x3aa   : > { %v2249_v35 = vmul.f32 %v3375_v24, %v4947_v40  ;;  %v3381_v42 = vadd.f32 %v4938_v52, %v2202_v58  ;;  %v2296_v10 = vpack.c.bf16 %v2285_v44, %v2284_v23  ;;  %v3681_v24 = vld [vmem:[%s4524_s4 + $0x38] sm:$0xff] }
 0x3ab   : > { %v2274_v17 = vadd.f32 %v4953_v6, %v2251_v26  ;;  %v2252_v28 = vmul.f32 %v3378_v50, %v4947_v40  ;;  %v3682_v50 = vld [vmem:[%s4524_s4 + $0x28] sm:$0xff] }
 0x3ac   : > { %v2272_v43 = vadd.f32 %v4953_v6, %v2249_v35  ;;  %v2250_v49 = vmul.f32 %v3381_v42, %v4947_v40  ;;  %3310 = vmatprep.mubr.bf16.mxu1 %v2296_v10  ;;  %v5005_v40 = vld [vmem:[%s5304_s17] ss:$0 sm:$0xff] }
 0x3ad   : > { %v2275_v16 = vadd.f32 %v4953_v6, %v2252_v28  ;;  %3311 = vmatmul.mubr.bf16.gmra.mrb[76].mxu1 %v2297_v11  ;;  %v2290_v39 = vmax.f32 %v2274_v17, 0.0 }
 0x3ae   : > { %v2273_v31 = vadd.f32 %v4953_v6, %v2250_v49  ;;  %v2288_v54 = vmax.f32 %v2272_v43, 0.0  ;;  %v5010_v6 = vld [vmem:[%s5305_s2] ss:$0 sm:$0xff] }
 0x3af   : > { %v2291_v18 = vmax.f32 %v2275_v16, 0.0 }
 0x3b0   : > { %v2289_v57 = vmax.f32 %v2273_v31, 0.0 }
 0x3b1   : > { %v2299_v52 = vpack.c.bf16 %v2291_v18, %v2290_v39 }
 0x3b2   : > { %v2298_v60 = vpack.c.bf16 %v2289_v57, %v2288_v54  ;;  %v3683_v54 = vld [vmem:[%s4524_s4 + $0x50] sm:$0xff] }
 0x3b4   : > { %3314 = vmatprep.mubr.bf16.mxu1 %v2298_v60  ;;  %v3684_v60 = vld [vmem:[%s4524_s4 + $0x40] sm:$0xff] }
 0x3b5   : > { %3315 = vmatmul.mubr.bf16.gmra.mrb[80].mxu1 %v2299_v52 }
 0x470   : > { %v3304_v25 = vpop.f32.mrb[68].mxu1 }
 0x471   : > { %v2470_v8 = vmul.f32 %v3304_v25, %v5005_v40  ;;  %v2398_v61 = vpop.f32.mrb[69].mxu1 }
 0x472   : > { %v2468_v56 = vmul.f32 %v5005_v40, %v2398_v61  ;;  %v3305_v62 = vpop.f32.mrb[70].mxu1 }
 0x473   : > { %v2493_v0 = vadd.f32 %v5010_v6, %v2470_v8  ;;  %v2471_v22 = vmul.f32 %v3305_v62, %v5005_v40  ;;  %v2401_v55 = vpop.f32.mrb[71].mxu1 }
 0x474   : > { %v2491_v13 = vadd.f32 %v5010_v6, %v2468_v56  ;;  %v2469_v19 = vmul.f32 %v5005_v40, %v2401_v55  ;;  %v3685_v56 = vld [vmem:[%s4524_s4 + $0x58] sm:$0xff] }
 0x475   : > { %v2509_v27 = vadd.f32 %v3675_v14, %v2493_v0  ;;  %v2494_v2 = vadd.f32 %v5010_v6, %v2471_v22  ;;  %v3686_v22 = vld [vmem:[%s4524_s4 + $0x48] sm:$0xff] }
 0x476   : > { %v2507_v33 = vadd.f32 %v3676_v36, %v2491_v13  ;;  %v2492_v21 = vadd.f32 %v5010_v6, %v2469_v19 }
 0x477   : > { %v2525_v7 = vmax.f32 %v2509_v27, 0.0  ;;  %v2510_v34 = vadd.f32 %v3677_v9, %v2494_v2 }
 0x478   : > { %v2523_v51 = vmax.f32 %v2507_v33, 0.0  ;;  %v2508_v5 = vadd.f32 %v3678_v4, %v2492_v21  ;;  %v3308_v41 = vpop.f32.mrb[72].mxu1  ;;  %v3687_v4 = vld [vmem:[%s4524_s4 + $0x70] sm:$0xff] }
 0x479   : > { %2541 = vst [vmem:[%s5026_s3 + $0x10] sm:$0xff] %v2525_v7  ;;  %v2526_v48 = vmax.f32 %v2510_v34, 0.0  ;;  %v2474_v32 = vmul.f32 %v3308_v41, %v5005_v40  ;;  %v2414_v53 = vpop.f32.mrb[73].mxu1 }
 0x47a   : > { %2539 = vst [vmem:[%s5026_s3] sm:$0xff] %v2523_v51  ;;  %v2524_v1 = vmax.f32 %v2508_v5, 0.0  ;;  %v2472_v59 = vmul.f32 %v5005_v40, %v2414_v53  ;;  %v3309_v38 = vpop.f32.mrb[74].mxu1 }
 0x47b   : > { %2542 = vst [vmem:[%s5026_s3 + $0x18] sm:$0xff] %v2526_v48  ;;  %v2497_v63 = vadd.f32 %v5010_v6, %v2474_v32  ;;  %v2475_v46 = vmul.f32 %v3309_v38, %v5005_v40  ;;  %v2417_v15 = vpop.f32.mrb[75].mxu1  ;;  %v3688_v48 = vld [vmem:[%s4524_s4 + $0x60] sm:$0xff] }
 0x47c   : > { %2540 = vst [vmem:[%s5026_s3 + $0x8] sm:$0xff] %v2524_v1  ;;  %v2495_v47 = vadd.f32 %v5010_v6, %v2472_v59  ;;  %v2473_v3 = vmul.f32 %v5005_v40, %v2417_v15  ;;  %v3689_v59 = vld [vmem:[%s4524_s4 + $0x78] sm:$0xff] }
 0x47d   : > { %v2513_v30 = vadd.f32 %v3679_v12, %v2497_v63  ;;  %v2498_v37 = vadd.f32 %v5010_v6, %v2475_v46  ;;  %v3690_v63 = vld [vmem:[%s4524_s4 + $0x68] sm:$0xff]  ;;  %s4039_s4 = smov [#allocation13]  }
 0x47e   : > { %v2511_v20 = vadd.f32 %v3680_v29, %v2495_v47  ;;  %v2496_v23 = vadd.f32 %v5010_v6, %v2473_v3  ;;  %s3869_s1 = sshll.u32 %s4039_s4, 4  ;;  %s3870_s1 = int_to_ptr.vmem [resolvable:$false] %s3869_s1 }
 0x47f   : > { %v2529_v44 = vmax.f32 %v2513_v30, 0.0  ;;  %v2514_v45 = vadd.f32 %v3681_v24, %v2498_v37  ;;  %s3871_s18 = scalar_lea.vmem %s3870_s1, 4096  ;;  %p3872_p9 = scmp.lt.s32.totalorder %s5080_s0, %s3870_s1 }
 0x480   : > { %v2527_v26 = vmax.f32 %v2511_v20, 0.0  ;;  %v2512_v58 = vadd.f32 %v3682_v50, %v2496_v23  ;;  %v3312_v11 = vpop.f32.mrb[76].mxu1  ;;  %p3873_p7 = scmp.lt.s32.totalorder %s3871_s18, %s3865_s25 }
 0x481   : > { %2545 = vst [vmem:[%s5026_s3 + $0x30] sm:$0xff] %v2529_v44  ;;  %v2530_v35 = vmax.f32 %v2514_v45, 0.0  ;;  %v2478_v42 = vmul.f32 %v3312_v11, %v5005_v40  ;;  %v2430_v10 = vpop.f32.mrb[77].mxu1 }
 0x482   : > { %2543 = vst [vmem:[%s5026_s3 + $0x20] sm:$0xff] %v2527_v26  ;;  %v2528_v17 = vmax.f32 %v2512_v58, 0.0  ;;  %v2476_v28 = vmul.f32 %v5005_v40, %v2430_v10  ;;  %v3313_v43 = vpop.f32.mrb[78].mxu1  ;;  %p3874_p6 = por %p3873_p7, %p3872_p9 }
 0x483   : > { %2546 = vst [vmem:[%s5026_s3 + $0x38] sm:$0xff] %v2530_v35  ;;  %v2501_v49 = vadd.f32 %v5010_v6, %v2478_v42  ;;  %v2479_v16 = vmul.f32 %v3313_v43, %v5005_v40  ;;  %v2433_v31 = vpop.f32.mrb[79].mxu1 }
 0x484   : > { %2544 = vst [vmem:[%s5026_s3 + $0x28] sm:$0xff] %v2528_v17  ;;  %v2499_v39 = vadd.f32 %v5010_v6, %v2476_v28  ;;  %v2477_v18 = vmul.f32 %v5005_v40, %v2433_v31  ;;  %p3875_p13 = pnand %p3874_p6, %p3868_p2 }
 0x485   : > { %v2517_v57 = vadd.f32 %v3683_v54, %v2501_v49  ;;  %v2502_v52 = vadd.f32 %v5010_v6, %v2479_v16 }
 0x486   : > { %v2515_v25 = vadd.f32 %v3684_v60, %v2499_v39  ;;  %v2500_v8 = vadd.f32 %v5010_v6, %v2477_v18 }
 0x487   : > { %v2533_v61 = vmax.f32 %v2517_v57, 0.0  ;;  %v2518_v62 = vadd.f32 %v3685_v56, %v2502_v52 }
 0x488   : > { %v2531_v0 = vmax.f32 %v2515_v25, 0.0  ;;  %v2516_v55 = vadd.f32 %v3686_v22, %v2500_v8  ;;  %v3316_v13 = vpop.f32.mrb[80].mxu1 }
 0x489   : > { %2549 = vst [vmem:[%s5026_s3 + $0x50] sm:$0xff] %v2533_v61  ;;  %v2534_v19 = vmax.f32 %v2518_v62, 0.0  ;;  %v2482_v14 = vmul.f32 %v3316_v13, %v5005_v40  ;;  %v2446_v27 = vpop.f32.mrb[81].mxu1 }
 0x48a   : > { %2547 = vst [vmem:[%s5026_s3 + $0x40] sm:$0xff] %v2531_v0  ;;  %v2532_v2 = vmax.f32 %v2516_v55, 0.0  ;;  %v2480_v36 = vmul.f32 %v5005_v40, %v2446_v27  ;;  %v3317_v33 = vpop.f32.mrb[82].mxu1 }
 0x48b   : > { %2550 = vst [vmem:[%s5026_s3 + $0x58] sm:$0xff] %v2534_v19  ;;  %v2505_v21 = vadd.f32 %v5010_v6, %v2482_v14  ;;  %v2483_v7 = vmul.f32 %v3317_v33, %v5005_v40  ;;  %v2449_v9 = vpop.f32.mrb[83].mxu1 }
 0x48c   : > { %2548 = vst [vmem:[%s5026_s3 + $0x48] sm:$0xff] %v2532_v2  ;;  %v2503_v34 = vadd.f32 %v5010_v6, %v2480_v36  ;;  %v2481_v51 = vmul.f32 %v5005_v40, %v2449_v9 }
 0x48d   : > { %v2521_v5 = vadd.f32 %v3687_v4, %v2505_v21  ;;  %v2506_v41 = vadd.f32 %v5010_v6, %v2483_v7 }
 0x48e   : > { %v2519_v32 = vadd.f32 %v3688_v48, %v2503_v34  ;;  %v2504_v53 = vadd.f32 %v5010_v6, %v2481_v51 }
 0x48f   : > { %v2537_v1 = vmax.f32 %v2521_v5, 0.0  ;;  %v2522_v38 = vadd.f32 %v3689_v59, %v2506_v41 }
 0x490   : > { %v2535_v40 = vmax.f32 %v2519_v32, 0.0  ;;  %v2520_v46 = vadd.f32 %v3690_v63, %v2504_v53 }
 0x491   : > { %2553 = vst [vmem:[%s5026_s3 + $0x70] sm:$0xff] %v2537_v1  ;;  %v2538_v15 = vmax.f32 %v2522_v38, 0.0 }
 0x492   : > { %2551 = vst [vmem:[%s5026_s3 + $0x60] sm:$0xff] %v2535_v40  ;;  %v2536_v6 = vmax.f32 %v2520_v46, 0.0 }
 0x493   : > { %2554 = vst [vmem:[%s5026_s3 + $0x78] sm:$0xff] %v2538_v15 }
 0x494   : > { %2552 = vst [vmem:[%s5026_s3 + $0x68] sm:$0xff] %v2536_v6 }
 0x495   : > { %3878 = shalt.err (!%p3875_p13)
}
 0x496   : > { %s3879_s10 = scalar_lea.hbm %s5086_s14, 2048  ;;  %s3883_s9 = scalar_lea.hbm %s5307_s6, 8192 }
 0x497   : > { %p3880_p11 = scmp.ne.s32.totalorder %s5086_s14, %s3879_s10  ;;  %p3884_p3 = scmp.lt.u32.totalorder %s5086_s14, %s5307_s6 }
 0x498   : > { %p3885_p12 = scmp.lt.u32.totalorder %s3883_s9, %s3879_s10  ;;  %p3887_p5 = scmp.lt.u32.totalorder %s3879_s10, %s5086_s14 }
 0x499   : > { %p3881_p0 = pnand %p3880_p11, %p5308_p10 }
 0x49a   : > { %p3886_p4 = por %p3885_p12, %p3884_p3 }
 0x49b   : > { %p3882_p1 = pneg %p3881_p0 }
 0x49c   : > { %p3888_p8 = por %p3887_p5, %p3886_p4 }
 0x49e   : > { %p3889_p2 = pnand %p3888_p8, %p3882_p1 }
 0x4a0   : > { %3892 = shalt.err (!%p3889_p2)
}
 0x4a1   : > { %s4040_s21 = smov 128   ;;  %s4041_s19 = smov 8  }
 0x4a2   : > { %3432 = dma.vmem_to_hbm [thread:$0]  (%p5308_p10), %s5080_s0, 2048, %s5086_s14, %s2556_s15, %s4040_s21, %s4040_s21, %s4041_s19  }
 0x4a3 PF: > { %s5309_s11 = sld [smem:[#allocation35_spill]]  ;;  %p3465_p9 = scmp.ge.s32.totalorder %s4027_s16, 2 }
 0x4a4   : > { %s2587_s5 = sand.u32 1, %s3999_s27  }
 0x4a5   : > { %s2588_s30 = scalar_lea.sflag [#allocation4], %s2587_s5 }
 0x4a9   : > { %p5310_p7 = scmp.ne.s32.totalorder %s5309_s11, 0 }
 0x4ab   : > { %p3455_p6 = pnand %p3465_p9, %p5310_p7 }
 0x4ad   : > { %3970 = dma.done.wait (!%p3455_p6), %s2588_s30, 2048  }
 0x4ae   : > { %3972 = vsyncadd (!%p3455_p6), %s2588_s30, 4294965248  ;;  %s33_s16 = sadd.s32 1, %s4027_s16   ;;  %s5312_s21 = sld [smem:[#allocation21_spill]] }
 0x4af   : > { %p5119_p13 = scmp.ge.s32.totalorder %s33_s16, 6   ;;  %s5313_s22 = sld [smem:[#allocation22_spill]] }
 0x4b0   : > { %s5314_s20 = sld [smem:[#allocation23_spill]]  ;;  %s5315_s7 = smov %s4269_s24 }
 0x4b1   : > { %s5316_s0 = sld [smem:[#allocation34_spill]]  ;;  %s5317_s30 = sld [smem:[#allocation26_spill]] }
 0x4b2   : > { %s5318_s14 = sld [smem:[#allocation27_spill]]  ;;  %s5319_s15 = sld [smem:[#allocation29_spill]] }
 0x4b3   : > { %s5320_s4 = sld [smem:[#allocation30_spill]]  ;;  %s5323_s25 = smov %s3995_s26 }
 0x4b4   : > { %s5324_s26 = smov %s5315_s7  ;;  %s5325_s27 = smov %s4003_s28 }
 0x4b5   : > { %s5326_s28 = smov %s4007_s29  ;;  %32 = sbr.rel (!%p5119_p13) target bundleno = 28 (0x1c), region = 151 }
 0x4b6   : > { %s5322_s24 = smov %s5314_s20 }
 0x4b7   : > { %s5327_s29 = smov %s5316_s0 }
 0x4b8   : > { %s5328_s13 = smov %s5318_s14  ;;  %s5329_s14 = smov %s5319_s15 }
 0x4b9   : > { %s5330_s15 = smov %s5320_s4 }
 0x4bc   :  { %2593 = vsyncpa [#allocation3], 1 }
 0x4bd   :  { %2595 = vsyncpa [#allocation3 + $0x1], 1 }
 0x4be   :  { %2596 = vsyncpa [#allocation6], 1 }
 0x4bf   :  { %2598 = vsyncpa [#allocation6 + $0x1], 1 }
 0x4c0   :  { %2599 = vsyncpa [#allocation9], 1 }
 0x4c1   :  { %2600 = vsyncpa [#allocation12], 1 }
 0x4c2   :  { %2601 = vsyncpa [#allocation4], 1 }
 0x4c3   :  { %2603 = vsyncpa [#allocation4 + $0x1], 1 }

</bundles_post_ra>
